<compile_context>
chip_gen: v7x
topology: tpu7x:2x2x1
jax: 0.10.0
libtpu: 0.0.40
codegen_flags: <defaults>
</compile_context>

<pallas_src>
import numpy as np
import jax
import jax.numpy as jnp
from jax import lax
from jax.experimental import pallas as pl
from jax.experimental.pallas import tpu as pltpu

# ----- static configuration (small shapes implied by the forward) ------------
N, C_IN, H, W = 2, 4, 16, 16
C_OUT, K, STRIDE, PAD, GROUPS = 8, 5, 1, 2, 2
NEG_SLOPE = 0.62

EDGE = K - 1 - PAD                         # halo of the equivalent direct conv (=2)
H_OUT = (H - 1) * STRIDE - 2 * PAD + K     # = 16
W_OUT = (W - 1) * STRIDE - 2 * PAD + K     # = 16
HW = H_OUT * W_OUT                         # output positions per image (=256)
HP, WP = H + 2 * EDGE, W + 2 * EDGE        # padded spatial dims (=20, 20)
FLAT = N * HP * WP                         # flattened padded length (=800)
P_IN = 896                                 # lane-padded input length (>= FLAT, mult of 128)
PW = 768                                   # matmul lane width (mult of 128):
                                           #   covers max valid pos 715, and
                                           #   max tap shift 84 + PW <= P_IN
KKC = K * K * C_IN                         # contraction dim (=100)


# ----- Pallas kernel: im2col + matmul + bias + leaky + masked global pool ----
def convt_leaky_gap_kernel(wt_ref, xp_ref, b_ref, m_ref, o_ref, patches_ref):
    # wt_ref     : (C_OUT, KKC)  flipped / group-block-diagonal weights
    # xp_ref     : (C_IN, P_IN)  padded input, flattened per channel (n,hp,wp)
    # b_ref      : (C_OUT, 1)    bias
    # m_ref      : (N, PW)       pooling weights: 1/HW at valid positions, else 0
    # o_ref      : (N, C_OUT)    pooled output
    # patches_ref: (KKC, PW)     VMEM scratch for the im2col matrix
    #
    # Tap (kh, kw) reads input element p0 + kh*WP + kw for output position p0
    # (p0 indexed in the padded grid); build all 25 shifted rows in VMEM.
    for kh in range(K):
        for kw in range(K):
            kk = kh * K + kw
            d = kh * WP + kw                       # static lane shift (0..84)
            patches_ref[kk * C_IN:(kk + 1) * C_IN, :] = xp_ref[:, d:d + PW]

    # one lane-dense MXU matmul: (8,100) x (100,768) -> (8,768)
    y = jnp.dot(wt_ref[...], patches_ref[...], preferred_element_type=jnp.float32)
    y = y + b_ref[...]                             # bias broadcast
    y = jnp.where(y > 0.0, y, y * NEG_SLOPE)       # torch.where(x>0, x, 0.62*x)

    # adaptive_avg_pool2d((1,1)): masked mean over the 256 valid lanes of each
    # image, expressed as a second tiny matmul (contract the lane dim of both),
    # giving the result directly in (N, C_OUT) order.
    o_ref[...] = lax.dot_general(m_ref[...], y, (((1,), (1,)), ((), ())),
                                 preferred_element_type=jnp.float32)


# ----- one-time preparation ("module init", NOT in the per-call path) --------
def prepare_weights(w_t, bias):
    """PyTorch ConvTranspose2d weight (C_in, C_out//groups, K, K) -> kernel layout."""
    cin_g, cout_g = C_IN // GROUPS, C_OUT // GROUPS
    w_flip = w_t[:, :, ::-1, ::-1].astype(jnp.float32)     # flip spatial taps
    wf = jnp.zeros((K, K, C_IN, C_OUT), jnp.float32)       # dense, group block-diagonal
    for g in range(GROUPS):
        blk = jnp.transpose(w_flip[g * cin_g:(g + 1) * cin_g], (2, 3, 0, 1))
        wf = wf.at[:, :,
                   g * cin_g:(g + 1) * cin_g,
                   g * cout_g:(g + 1) * cout_g].set(blk)
    wt_mat = wf.reshape(KKC, C_OUT).T                       # (C_OUT, KKC)
    b2d = bias.astype(jnp.float32).reshape(C_OUT, 1)
    return jnp.asarray(wt_mat), b2d


def prepare_pool_weights():
    """(N, PW) mask holding 1/HW at lanes that are real output positions of image n."""
    m = np.zeros((N, PW), np.float32)
    for n in range(N):
        for h in range(H_OUT):
            base = n * HP * WP + h * WP
            m[n, base:base + W_OUT] = 1.0 / HW
    return jnp.asarray(m)


# ----- jitted forward: tiny layout prep + one fused pallas_call ---------------
@jax.jit
def pallas_forward(x_nchw, wt_mat, b2d, pool_w):
    # <16 KB of wrapper work: halo-pad, channel-major transpose, flatten, lane-pad
    x = jnp.pad(x_nchw.astype(jnp.float32),
                ((0, 0), (0, 0), (EDGE, EDGE), (EDGE, EDGE)))     # (N, C_IN, HP, WP)
    x = jnp.transpose(x, (1, 0, 2, 3)).reshape(C_IN, FLAT)        # (C_IN, 800)
    xflat = jnp.pad(x, ((0, 0), (0, P_IN - FLAT)))                # (C_IN, 896)

    pooled = pl.pallas_call(
        convt_leaky_gap_kernel,
        out_shape=jax.ShapeDtypeStruct((N, C_OUT), jnp.float32),
        grid=(1,),
        in_specs=[
            pl.BlockSpec((C_OUT, KKC), lambda i: (0, 0)),
            pl.BlockSpec((C_IN, P_IN), lambda i: (0, 0)),
            pl.BlockSpec((C_OUT, 1), lambda i: (0, 0)),
            pl.BlockSpec((N, PW), lambda i: (0, 0)),
        ],
        out_specs=pl.BlockSpec((N, C_OUT), lambda i: (0, 0)),
        scratch_shapes=[pltpu.VMEM((KKC, PW), jnp.float32)],
        compiler_params=pltpu.CompilerParams(
            dimension_semantics=("arbitrary",)),
        cost_estimate=pl.CostEstimate(
            flops=2 * C_OUT * KKC * PW + 2 * N * C_OUT * PW,
            transcendentals=0,
            bytes_accessed=4 * (C_OUT * KKC + C_IN * P_IN + C_OUT
                                + N * PW + N * C_OUT)),
    )(wt_mat, xflat, b2d, pool_w)

    # match torch output shape (N, C_out, 1, 1) -- pure reshape, no transpose
    return pooled.reshape(N, C_OUT, 1, 1)


# ----- independent reference (direct ConvTranspose2d semantics) ---------------
def reference_forward(x_nchw, w_t, bias):
    """Direct transposed-conv scatter-add; shares NO layout-prep code with the kernel."""
    cin_g, cout_g = C_IN // GROUPS, C_OUT // GROUPS
    Hf, Wf = (H - 1) * STRIDE + K, (W - 1) * STRIDE + K
    x = x_nchw.astype(jnp.float32)
    w = w_t.astype(jnp.float32)
    y = jnp.zeros((N, C_OUT, Hf, Wf), jnp.float32)
    for g in range(GROUPS):
        xs = x[:, g * cin_g:(g + 1) * cin_g]                      # (N, cin_g, H, W)
        for kh in range(K):
            for kw in range(K):
                wg = w[g * cin_g:(g + 1) * cin_g, :, kh, kw]      # (cin_g, cout_g)
                contrib = jnp.einsum('ncij,cd->ndij', xs, wg)     # (N, cout_g, H, W)
                y = y.at[:, g * cout_g:(g + 1) * cout_g,
                         kh:kh + H, kw:kw + W].add(contrib)
    y = y[:, :, PAD:Hf - PAD, PAD:Wf - PAD] + bias.reshape(1, C_OUT, 1, 1)
    y = jnp.where(y > 0.0, y, y * NEG_SLOPE)
    return jnp.mean(y, axis=(2, 3)).reshape(N, C_OUT, 1, 1)


# ----- main -------------------------------------------------------------------
if __name__ == "__main__":
    key = jax.random.PRNGKey(0)
    kx, kw_, kb = jax.random.split(key, 3)
    x = jax.random.normal(kx, (N, C_IN, H, W), dtype=jnp.float32)
    # ConvTranspose2d weight/bias shapes (analogous to the module's __init__):
    w_t = 0.1 * jax.random.normal(kw_, (C_IN, C_OUT // GROUPS, K, K), dtype=jnp.float32)
    bias = 0.1 * jax.random.normal(kb, (C_OUT,), dtype=jnp.float32)

    # one-time preparation (module init)
    wt_mat, b2d = prepare_weights(w_t, bias)
    pool_w = prepare_pool_weights()

    out = jax.block_until_ready(pallas_forward(x, wt_mat, b2d, pool_w))
    ref = jax.block_until_ready(reference_forward(x, w_t, bias))

    assert out.shape == (N, C_OUT, 1, 1)
    assert jnp.allclose(out, ref, atol=1e-4, rtol=1e-4), (
        f"max abs err {jnp.max(jnp.abs(out - ref))}")

    print("KERNEL_OK")
</pallas_src>

<mosaic_0001>
module attributes {stable_mosaic.version = 11 : i64} {
  func.func @convt_leaky_gap_kernel(%arg0: i32, %arg1: memref<8x100xf32, #tpu.memory_space<vmem>>, %arg2: memref<4x896xf32, #tpu.memory_space<vmem>>, %arg3: memref<8x1xf32, #tpu.memory_space<vmem>>, %arg4: memref<2x768xf32, #tpu.memory_space<vmem>>, %arg5: memref<2x8xf32, #tpu.memory_space<vmem>>, %arg6: memref<100x768xf32, #tpu.memory_space<vmem>>) attributes {dimension_semantics = [#tpu.dimension_semantics<arbitrary>], iteration_bounds = array<i64: 1>, scalar_prefetch = 0 : i64, scratch_operands = 1 : i64, tpu.core_type = #tpu.core_type<tc>, window_params = [{pipeline_mode = #tpu.pipeline_mode<synchronous>, transform_indices = @transform_0, window_bounds = array<i64: 8, 100>}, {pipeline_mode = #tpu.pipeline_mode<synchronous>, transform_indices = @transform_1, window_bounds = array<i64: 4, 896>}, {pipeline_mode = #tpu.pipeline_mode<synchronous>, transform_indices = @transform_2, window_bounds = array<i64: 8, 1>}, {pipeline_mode = #tpu.pipeline_mode<synchronous>, transform_indices = @transform_3, window_bounds = array<i64: 2, 768>}, {pipeline_mode = #tpu.pipeline_mode<synchronous>, transform_indices = @transform_4, window_bounds = array<i64: 2, 8>}]} {
    %c0 = arith.constant 0 : index
    %c0_0 = arith.constant 0 : index
    %0 = vector.load %arg2[%c0, %c0_0] : memref<4x896xf32, #tpu.memory_space<vmem>>, vector<4x768xf32>
    %c0_1 = arith.constant 0 : index
    %c0_2 = arith.constant 0 : index
    %1 = vector.load %arg6[%c0_1, %c0_2] : memref<100x768xf32, #tpu.memory_space<vmem>>, vector<4x768xf32>
    tpu.vector_store %arg6[%c0_1, %c0_2], %0 {strides = array<i32>} : memref<100x768xf32, #tpu.memory_space<vmem>>, vector<4x768xf32>,
    %c0_3 = arith.constant 0 : index
    %c1 = arith.constant 1 : index
    %2 = vector.load %arg2[%c0_3, %c1] : memref<4x896xf32, #tpu.memory_space<vmem>>, vector<4x768xf32>
    %c4 = arith.constant 4 : index
    %c0_4 = arith.constant 0 : index
    %3 = vector.load %arg6[%c4, %c0_4] : memref<100x768xf32, #tpu.memory_space<vmem>>, vector<4x768xf32>
    tpu.vector_store %arg6[%c4, %c0_4], %2 {strides = array<i32>} : memref<100x768xf32, #tpu.memory_space<vmem>>, vector<4x768xf32>,
    %c0_5 = arith.constant 0 : index
    %c2 = arith.constant 2 : index
    %4 = vector.load %arg2[%c0_5, %c2] : memref<4x896xf32, #tpu.memory_space<vmem>>, vector<4x768xf32>
    %c8 = arith.constant 8 : index
    %c0_6 = arith.constant 0 : index
    %5 = vector.load %arg6[%c8, %c0_6] : memref<100x768xf32, #tpu.memory_space<vmem>>, vector<4x768xf32>
    tpu.vector_store %arg6[%c8, %c0_6], %4 {strides = array<i32>} : memref<100x768xf32, #tpu.memory_space<vmem>>, vector<4x768xf32>,
    %c0_7 = arith.constant 0 : index
    %c3 = arith.constant 3 : index
    %6 = vector.load %arg2[%c0_7, %c3] : memref<4x896xf32, #tpu.memory_space<vmem>>, vector<4x768xf32>
    %c12 = arith.constant 12 : index
    %c0_8 = arith.constant 0 : index
    %7 = vector.load %arg6[%c12, %c0_8] : memref<100x768xf32, #tpu.memory_space<vmem>>, vector<4x768xf32>
    tpu.vector_store %arg6[%c12, %c0_8], %6 {strides = array<i32>} : memref<100x768xf32, #tpu.memory_space<vmem>>, vector<4x768xf32>,
    %c0_9 = arith.constant 0 : index
    %c4_10 = arith.constant 4 : index
    %8 = vector.load %arg2[%c0_9, %c4_10] : memref<4x896xf32, #tpu.memory_space<vmem>>, vector<4x768xf32>
    %c16 = arith.constant 16 : index
    %c0_11 = arith.constant 0 : index
    %9 = vector.load %arg6[%c16, %c0_11] : memref<100x768xf32, #tpu.memory_space<vmem>>, vector<4x768xf32>
    tpu.vector_store %arg6[%c16, %c0_11], %8 {strides = array<i32>} : memref<100x768xf32, #tpu.memory_space<vmem>>, vector<4x768xf32>,
    %c0_12 = arith.constant 0 : index
    %c20 = arith.constant 20 : index
    %10 = vector.load %arg2[%c0_12, %c20] : memref<4x896xf32, #tpu.memory_space<vmem>>, vector<4x768xf32>
    %c20_13 = arith.constant 20 : index
    %c0_14 = arith.constant 0 : index
    %11 = vector.load %arg6[%c20_13, %c0_14] : memref<100x768xf32, #tpu.memory_space<vmem>>, vector<4x768xf32>
    tpu.vector_store %arg6[%c20_13, %c0_14], %10 {strides = array<i32>} : memref<100x768xf32, #tpu.memory_space<vmem>>, vector<4x768xf32>,
    %c0_15 = arith.constant 0 : index
    %c21 = arith.constant 21 : index
    %12 = vector.load %arg2[%c0_15, %c21] : memref<4x896xf32, #tpu.memory_space<vmem>>, vector<4x768xf32>
    %c24 = arith.constant 24 : index
    %c0_16 = arith.constant 0 : index
    %13 = vector.load %arg6[%c24, %c0_16] : memref<100x768xf32, #tpu.memory_space<vmem>>, vector<4x768xf32>
    tpu.vector_store %arg6[%c24, %c0_16], %12 {strides = array<i32>} : memref<100x768xf32, #tpu.memory_space<vmem>>, vector<4x768xf32>,
    %c0_17 = arith.constant 0 : index
    %c22 = arith.constant 22 : index
    %14 = vector.load %arg2[%c0_17, %c22] : memref<4x896xf32, #tpu.memory_space<vmem>>, vector<4x768xf32>
    %c28 = arith.constant 28 : index
    %c0_18 = arith.constant 0 : index
    %15 = vector.load %arg6[%c28, %c0_18] : memref<100x768xf32, #tpu.memory_space<vmem>>, vector<4x768xf32>
    tpu.vector_store %arg6[%c28, %c0_18], %14 {strides = array<i32>} : memref<100x768xf32, #tpu.memory_space<vmem>>, vector<4x768xf32>,
    %c0_19 = arith.constant 0 : index
    %c23 = arith.constant 23 : index
    %16 = vector.load %arg2[%c0_19, %c23] : memref<4x896xf32, #tpu.memory_space<vmem>>, vector<4x768xf32>
    %c32 = arith.constant 32 : index
    %c0_20 = arith.constant 0 : index
    %17 = vector.load %arg6[%c32, %c0_20] : memref<100x768xf32, #tpu.memory_space<vmem>>, vector<4x768xf32>
    tpu.vector_store %arg6[%c32, %c0_20], %16 {strides = array<i32>} : memref<100x768xf32, #tpu.memory_space<vmem>>, vector<4x768xf32>,
    %c0_21 = arith.constant 0 : index
    %c24_22 = arith.constant 24 : index
    %18 = vector.load %arg2[%c0_21, %c24_22] : memref<4x896xf32, #tpu.memory_space<vmem>>, vector<4x768xf32>
    %c36 = arith.constant 36 : index
    %c0_23 = arith.constant 0 : index
    %19 = vector.load %arg6[%c36, %c0_23] : memref<100x768xf32, #tpu.memory_space<vmem>>, vector<4x768xf32>
    tpu.vector_store %arg6[%c36, %c0_23], %18 {strides = array<i32>} : memref<100x768xf32, #tpu.memory_space<vmem>>, vector<4x768xf32>,
    %c0_24 = arith.constant 0 : index
    %c40 = arith.constant 40 : index
    %20 = vector.load %arg2[%c0_24, %c40] : memref<4x896xf32, #tpu.memory_space<vmem>>, vector<4x768xf32>
    %c40_25 = arith.constant 40 : index
    %c0_26 = arith.constant 0 : index
    %21 = vector.load %arg6[%c40_25, %c0_26] : memref<100x768xf32, #tpu.memory_space<vmem>>, vector<4x768xf32>
    tpu.vector_store %arg6[%c40_25, %c0_26], %20 {strides = array<i32>} : memref<100x768xf32, #tpu.memory_space<vmem>>, vector<4x768xf32>,
    %c0_27 = arith.constant 0 : index
    %c41 = arith.constant 41 : index
    %22 = vector.load %arg2[%c0_27, %c41] : memref<4x896xf32, #tpu.memory_space<vmem>>, vector<4x768xf32>
    %c44 = arith.constant 44 : index
    %c0_28 = arith.constant 0 : index
    %23 = vector.load %arg6[%c44, %c0_28] : memref<100x768xf32, #tpu.memory_space<vmem>>, vector<4x768xf32>
    tpu.vector_store %arg6[%c44, %c0_28], %22 {strides = array<i32>} : memref<100x768xf32, #tpu.memory_space<vmem>>, vector<4x768xf32>,
    %c0_29 = arith.constant 0 : index
    %c42 = arith.constant 42 : index
    %24 = vector.load %arg2[%c0_29, %c42] : memref<4x896xf32, #tpu.memory_space<vmem>>, vector<4x768xf32>
    %c48 = arith.constant 48 : index
    %c0_30 = arith.constant 0 : index
    %25 = vector.load %arg6[%c48, %c0_30] : memref<100x768xf32, #tpu.memory_space<vmem>>, vector<4x768xf32>
    tpu.vector_store %arg6[%c48, %c0_30], %24 {strides = array<i32>} : memref<100x768xf32, #tpu.memory_space<vmem>>, vector<4x768xf32>,
    %c0_31 = arith.constant 0 : index
    %c43 = arith.constant 43 : index
    %26 = vector.load %arg2[%c0_31, %c43] : memref<4x896xf32, #tpu.memory_space<vmem>>, vector<4x768xf32>
    %c52 = arith.constant 52 : index
    %c0_32 = arith.constant 0 : index
    %27 = vector.load %arg6[%c52, %c0_32] : memref<100x768xf32, #tpu.memory_space<vmem>>, vector<4x768xf32>
    tpu.vector_store %arg6[%c52, %c0_32], %26 {strides = array<i32>} : memref<100x768xf32, #tpu.memory_space<vmem>>, vector<4x768xf32>,
    %c0_33 = arith.constant 0 : index
    %c44_34 = arith.constant 44 : index
    %28 = vector.load %arg2[%c0_33, %c44_34] : memref<4x896xf32, #tpu.memory_space<vmem>>, vector<4x768xf32>
    %c56 = arith.constant 56 : index
    %c0_35 = arith.constant 0 : index
    %29 = vector.load %arg6[%c56, %c0_35] : memref<100x768xf32, #tpu.memory_space<vmem>>, vector<4x768xf32>
    tpu.vector_store %arg6[%c56, %c0_35], %28 {strides = array<i32>} : memref<100x768xf32, #tpu.memory_space<vmem>>, vector<4x768xf32>,
    %c0_36 = arith.constant 0 : index
    %c60 = arith.constant 60 : index
    %30 = vector.load %arg2[%c0_36, %c60] : memref<4x896xf32, #tpu.memory_space<vmem>>, vector<4x768xf32>
    %c60_37 = arith.constant 60 : index
    %c0_38 = arith.constant 0 : index
    %31 = vector.load %arg6[%c60_37, %c0_38] : memref<100x768xf32, #tpu.memory_space<vmem>>, vector<4x768xf32>
    tpu.vector_store %arg6[%c60_37, %c0_38], %30 {strides = array<i32>} : memref<100x768xf32, #tpu.memory_space<vmem>>, vector<4x768xf32>,
    %c0_39 = arith.constant 0 : index
    %c61 = arith.constant 61 : index
    %32 = vector.load %arg2[%c0_39, %c61] : memref<4x896xf32, #tpu.memory_space<vmem>>, vector<4x768xf32>
    %c64 = arith.constant 64 : index
    %c0_40 = arith.constant 0 : index
    %33 = vector.load %arg6[%c64, %c0_40] : memref<100x768xf32, #tpu.memory_space<vmem>>, vector<4x768xf32>
    tpu.vector_store %arg6[%c64, %c0_40], %32 {strides = array<i32>} : memref<100x768xf32, #tpu.memory_space<vmem>>, vector<4x768xf32>,
    %c0_41 = arith.constant 0 : index
    %c62 = arith.constant 62 : index
    %34 = vector.load %arg2[%c0_41, %c62] : memref<4x896xf32, #tpu.memory_space<vmem>>, vector<4x768xf32>
    %c68 = arith.constant 68 : index
    %c0_42 = arith.constant 0 : index
    %35 = vector.load %arg6[%c68, %c0_42] : memref<100x768xf32, #tpu.memory_space<vmem>>, vector<4x768xf32>
    tpu.vector_store %arg6[%c68, %c0_42], %34 {strides = array<i32>} : memref<100x768xf32, #tpu.memory_space<vmem>>, vector<4x768xf32>,
    %c0_43 = arith.constant 0 : index
    %c63 = arith.constant 63 : index
    %36 = vector.load %arg2[%c0_43, %c63] : memref<4x896xf32, #tpu.memory_space<vmem>>, vector<4x768xf32>
    %c72 = arith.constant 72 : index
    %c0_44 = arith.constant 0 : index
    %37 = vector.load %arg6[%c72, %c0_44] : memref<100x768xf32, #tpu.memory_space<vmem>>, vector<4x768xf32>
    tpu.vector_store %arg6[%c72, %c0_44], %36 {strides = array<i32>} : memref<100x768xf32, #tpu.memory_space<vmem>>, vector<4x768xf32>,
    %c0_45 = arith.constant 0 : index
    %c64_46 = arith.constant 64 : index
    %38 = vector.load %arg2[%c0_45, %c64_46] : memref<4x896xf32, #tpu.memory_space<vmem>>, vector<4x768xf32>
    %c76 = arith.constant 76 : index
    %c0_47 = arith.constant 0 : index
    %39 = vector.load %arg6[%c76, %c0_47] : memref<100x768xf32, #tpu.memory_space<vmem>>, vector<4x768xf32>
    tpu.vector_store %arg6[%c76, %c0_47], %38 {strides = array<i32>} : memref<100x768xf32, #tpu.memory_space<vmem>>, vector<4x768xf32>,
    %c0_48 = arith.constant 0 : index
    %c80 = arith.constant 80 : index
    %40 = vector.load %arg2[%c0_48, %c80] : memref<4x896xf32, #tpu.memory_space<vmem>>, vector<4x768xf32>
    %c80_49 = arith.constant 80 : index
    %c0_50 = arith.constant 0 : index
    %41 = vector.load %arg6[%c80_49, %c0_50] : memref<100x768xf32, #tpu.memory_space<vmem>>, vector<4x768xf32>
    tpu.vector_store %arg6[%c80_49, %c0_50], %40 {strides = array<i32>} : memref<100x768xf32, #tpu.memory_space<vmem>>, vector<4x768xf32>,
    %c0_51 = arith.constant 0 : index
    %c81 = arith.constant 81 : index
    %42 = vector.load %arg2[%c0_51, %c81] : memref<4x896xf32, #tpu.memory_space<vmem>>, vector<4x768xf32>
    %c84 = arith.constant 84 : index
    %c0_52 = arith.constant 0 : index
    %43 = vector.load %arg6[%c84, %c0_52] : memref<100x768xf32, #tpu.memory_space<vmem>>, vector<4x768xf32>
    tpu.vector_store %arg6[%c84, %c0_52], %42 {strides = array<i32>} : memref<100x768xf32, #tpu.memory_space<vmem>>, vector<4x768xf32>,
    %c0_53 = arith.constant 0 : index
    %c82 = arith.constant 82 : index
    %44 = vector.load %arg2[%c0_53, %c82] : memref<4x896xf32, #tpu.memory_space<vmem>>, vector<4x768xf32>
    %c88 = arith.constant 88 : index
    %c0_54 = arith.constant 0 : index
    %45 = vector.load %arg6[%c88, %c0_54] : memref<100x768xf32, #tpu.memory_space<vmem>>, vector<4x768xf32>
    tpu.vector_store %arg6[%c88, %c0_54], %44 {strides = array<i32>} : memref<100x768xf32, #tpu.memory_space<vmem>>, vector<4x768xf32>,
    %c0_55 = arith.constant 0 : index
    %c83 = arith.constant 83 : index
    %46 = vector.load %arg2[%c0_55, %c83] : memref<4x896xf32, #tpu.memory_space<vmem>>, vector<4x768xf32>
    %c92 = arith.constant 92 : index
    %c0_56 = arith.constant 0 : index
    %47 = vector.load %arg6[%c92, %c0_56] : memref<100x768xf32, #tpu.memory_space<vmem>>, vector<4x768xf32>
    tpu.vector_store %arg6[%c92, %c0_56], %46 {strides = array<i32>} : memref<100x768xf32, #tpu.memory_space<vmem>>, vector<4x768xf32>,
    %c0_57 = arith.constant 0 : index
    %c84_58 = arith.constant 84 : index
    %48 = vector.load %arg2[%c0_57, %c84_58] : memref<4x896xf32, #tpu.memory_space<vmem>>, vector<4x768xf32>
    %c96 = arith.constant 96 : index
    %c0_59 = arith.constant 0 : index
    %49 = vector.load %arg6[%c96, %c0_59] : memref<100x768xf32, #tpu.memory_space<vmem>>, vector<4x768xf32>
    tpu.vector_store %arg6[%c96, %c0_59], %48 {strides = array<i32>} : memref<100x768xf32, #tpu.memory_space<vmem>>, vector<4x768xf32>,
    %c0_60 = arith.constant 0 : index
    %c0_61 = arith.constant 0 : index
    %50 = vector.load %arg1[%c0_60, %c0_61] : memref<8x100xf32, #tpu.memory_space<vmem>>, vector<8x100xf32>
    %c0_62 = arith.constant 0 : index
    %c0_63 = arith.constant 0 : index
    %51 = vector.load %arg6[%c0_62, %c0_63] : memref<100x768xf32, #tpu.memory_space<vmem>>, vector<100x768xf32>
    %cst = arith.constant dense<0.000000e+00> : vector<8x768xf32>
    %52 = tpu.matmul %50, %51, %cst {dimension_numbers = #tpu.dot_dimension_numbers<[1], [0], [0], [1], [0, 0, 1, 1], [], []>} : vector<8x100xf32>, vector<100x768xf32>, vector<8x768xf32> -> vector<8x768xf32>
    %c0_64 = arith.constant 0 : index
    %c0_65 = arith.constant 0 : index
    %53 = vector.load %arg3[%c0_64, %c0_65] : memref<8x1xf32, #tpu.memory_space<vmem>>, vector<8x1xf32>
    %54 = vector.broadcast %53 : vector<8x1xf32> to vector<8x768xf32>
    %55 = arith.addf %52, %54 : vector<8x768xf32>
    %cst_66 = arith.constant 0.000000e+00 : f32
    %56 = vector.broadcast %cst_66 : f32 to vector<8x768xf32>
    %57 = arith.cmpf ogt, %55, %56 : vector<8x768xf32>
    %cst_67 = arith.constant 6.200000e-01 : f32
    %58 = vector.broadcast %cst_67 : f32 to vector<8x768xf32>
    %59 = arith.mulf %55, %58 : vector<8x768xf32>
    %60 = arith.select %57, %55, %59 : vector<8x768xi1>, vector<8x768xf32>
    %c0_68 = arith.constant 0 : index
    %c0_69 = arith.constant 0 : index
    %61 = vector.load %arg4[%c0_68, %c0_69] : memref<2x768xf32, #tpu.memory_space<vmem>>, vector<2x768xf32>
    %cst_70 = arith.constant dense<0.000000e+00> : vector<2x8xf32>
    %62 = tpu.matmul %61, %60, %cst_70 {dimension_numbers = #tpu.dot_dimension_numbers<[1], [1], [0], [0], [0, 0, 1, 0], [], []>} : vector<2x768xf32>, vector<8x768xf32>, vector<2x8xf32> -> vector<2x8xf32>
    %c0_71 = arith.constant 0 : index
    %c0_72 = arith.constant 0 : index
    %63 = vector.load %arg5[%c0_71, %c0_72] : memref<2x8xf32, #tpu.memory_space<vmem>>, vector<2x8xf32>
    tpu.vector_store %arg5[%c0_71, %c0_72], %62 {strides = array<i32>} : memref<2x8xf32, #tpu.memory_space<vmem>>, vector<2x8xf32>,
    return
  }
  func.func @transform_0(%arg0: i32) -> (i32, i32) {
    %c0_i32 = arith.constant 0 : i32
    %c0_i32_0 = arith.constant 0 : i32
    %c0_i32_1 = arith.constant 0 : i32
    return %c0_i32, %c0_i32_0 : i32, i32
  }
  func.func @transform_1(%arg0: i32) -> (i32, i32) {
    %c0_i32 = arith.constant 0 : i32
    %c0_i32_0 = arith.constant 0 : i32
    %c0_i32_1 = arith.constant 0 : i32
    return %c0_i32, %c0_i32_0 : i32, i32
  }
  func.func @transform_2(%arg0: i32) -> (i32, i32) {
    %c0_i32 = arith.constant 0 : i32
    %c0_i32_0 = arith.constant 0 : i32
    %c0_i32_1 = arith.constant 0 : i32
    return %c0_i32, %c0_i32_0 : i32, i32
  }
  func.func @transform_3(%arg0: i32) -> (i32, i32) {
    %c0_i32 = arith.constant 0 : i32
    %c0_i32_0 = arith.constant 0 : i32
    %c0_i32_1 = arith.constant 0 : i32
    return %c0_i32, %c0_i32_0 : i32, i32
  }
  func.func @transform_4(%arg0: i32) -> (i32, i32) {
    %c0_i32 = arith.constant 0 : i32
    %c0_i32_0 = arith.constant 0 : i32
    %c0_i32_1 = arith.constant 0 : i32
    return %c0_i32, %c0_i32_0 : i32, i32
  }
}

</mosaic_0001>

<bundles_post_ra>
// kernel: pallas_forward.1
= control target key start
LH: loop header
LB: loop body
LE: loop exit
PB: predicated region body
PF: predicated region fallthrough
CT: control target
= control target key end

     0   :  { %s1866_s19 = smov 127   ;;  %s1867_s20 = smov 126   ;;  %s2735_s0 = inlined_call_operand.vmem [shape: f32[8,100], index: 0, kind: input, shape index: {}]   ;;  %s2736_s1 = inlined_call_operand.vmem [shape: f32[4,896], index: 1, kind: input, shape index: {}]   ;;  %s2737_s2 = inlined_call_operand.vmem [shape: f32[8,1], index: 2, kind: input, shape index: {}]   ;;  %s2738_s3 = inlined_call_operand.vmem [shape: f32[2,768], index: 3, kind: input, shape index: {}]   ;;  %s2739_s4 = inlined_call_operand.hbm [shape: f32[2,8], index: 4, kind: output, shape index: {}]  }
   0x1   :  { %v1922_v0 = vld [vmem:[%s2736_s1] sm:$0xff]  ;;  %v1927_v1 = vld [vmem:[%s2736_s1 + $0x8] sm:$0xff] }
   0x2   :  { %50 = vrot.lane.b32.xlu0 %v1922_v0, %s1866_s19  ;;  %v1933_v2 = vcombine.high %v1922_v0, %v1922_v0  ;;  %v1937_v3 = vcombine.low %v1927_v1, %v1927_v1  ;;  %30 = vst [vmem:[#allocation2] sm:$0xf] %v1922_v0 }
   0x4   :  { %94 = vrot.lane.b32.xlu1 %v1933_v2, %s1867_s20  ;;  %31 = vst [vmem:[#allocation2 + $0x8] sm:$0xf] %v1933_v2 }
   0x6   :  { %52 = vrot.lane.b32.xlu0 %v1937_v3, %s1866_s19 }
   0x8   :  { %96 = vrot.lane.b32.xlu1 %v1927_v1, %s1867_s20 }
   0x9   :  { %9 = vsyncpa [#allocation4], 0  ;;  %v1949_v4 = vcombine.low %v1922_v0, %v1922_v0  ;;  %s1868_s21 = smov 125   ;;  %s1869_s22 = smov 124   ;;  %v19_v5 = vld [vmem:[%s2736_s1 + $0x8] sm:$0xff]  ;;  %v2059_v7 = vld [vmem:[%s2736_s1 + $0x10] sm:$0xff]  ;;  %v2071_v9 = vcombine.high %v1927_v1, %v1927_v1 }
   0xa   :  { %139 = vrot.lane.b32.xlu0 %v1922_v0, %s1868_s21  ;;  %s1870_s23 = smov 108   ;;  %s1871_s24 = smov 107   ;;  %v25_v6 = vcombine.high %v19_v5, %v19_v5  ;;  %32 = vst [vmem:[#allocation2 + $0x10] sm:$0xf] %v19_v5  ;;  %v2067_v8 = vcombine.low %v2059_v7, %v2059_v7  ;;  %vm62_vm0 = vcmask 1039360   ;;  %vm106_vm1 = vcmask 1031168  }
   0xb   :  { %s1872_s25 = smov 106   ;;  %s1873_s26 = smov 105   ;;  %vm151_vm2 = vcmask 1022976   ;;  %vm195_vm3 = vcmask 1014784   ;;  %vm240_vm4 = vcmask 883712   ;;  %vm284_vm5 = vcmask 875520  }
   0xc   :  { %141 = vrot.lane.b32.xlu1 %v1937_v3, %s1868_s21  ;;  %s1874_s27 = smov 104   ;;  %s1875_s28 = smov 88   ;;  %33 = vst [vmem:[#allocation2 + $0x18] sm:$0xf] %v25_v6  ;;  %vm329_vm6 = vcmask 867328   ;;  %v2150_v49 = vld [vmem:[%s2736_s1 + $0x10] sm:$0xff]  ;;  %v2184_v6 = vcombine.high %v2059_v7, %v2059_v7 }
   0xd   :  { %s1876_s29 = smov 87   ;;  %s1877_s30 = smov 86   ;;  %v2156_v51 = vcombine.high %v2150_v49, %v2150_v49  ;;  %34 = vst [vmem:[#allocation2 + $0x20] sm:$0xf] %v2150_v49  ;;  %vm373_vm7 = vcmask 859136   ;;  %vm418_vm8 = vcmask 850944  }
   0xe   :  { %48 = vrot.lane.b32.xlu0 %v1949_v4, %s1866_s19  ;;  %s1878_s5 = smov 85   ;;  %s1879_s6 = smov 84   ;;  %vm462_vm9 = vcmask 719872   ;;  %v1825_v5 = vld [vmem:[%s2736_s1 + $0x18] ss:$0 sps:$4 sm:$0xff]   ;;  %vm507_vm10 = vcmask 711680  }
   0xf   :  { %s1880_s7 = smov 68   ;;  %s1881_s8 = smov 67   ;;  %35 = vst [vmem:[#allocation2 + $0x28] sm:$0xf] %v2156_v51  ;;  %vm551_vm11 = vcmask 703488   ;;  %vm2744_vm12 = vcmask 695296  }
  0x10   :  { %92 = vrot.lane.b32.xlu1 %v1922_v0, %s1867_s20  ;;  %s1882_s9 = smov 66   ;;  %s1883_s10 = smov 65   ;;  %vm2743_vm13 = vcmask 687104   ;;  %vm2742_vm14 = vcmask 556032   ;;  %vm2748_vm15 = vcmask 547840  }
  0x11   :  { %s1884_s13 = smov 64   ;;  %s1885_s16 = smov 48  }
  0x12   :  { %137 = vrot.lane.b32.xlu0 %v1949_v4, %s1868_s21  ;;  %s1886_s17 = smov 47   ;;  %s1887_s18 = smov 46  }
  0x13   :  { %s2740_s11 = smov 45  }
  0x14   :  { %183 = vrot.lane.b32.xlu1 %v1933_v2, %s1869_s22 }
  0x16   :  { %185 = vrot.lane.b32.xlu0 %v1927_v1, %s1869_s22 }
  0x18   :  { %228 = vrot.lane.b32.xlu1 %v1922_v0, %s1870_s23 }
  0x1a   :  { %230 = vrot.lane.b32.xlu0 %v1937_v3, %s1870_s23 }
  0x1c   :  { %272 = vrot.lane.b32.xlu1 %v1933_v2, %s1871_s24 }
  0x1e   :  { %274 = vrot.lane.b32.xlu0 %v1927_v1, %s1871_s24 }
  0x20   :  { %317 = vrot.lane.b32.xlu1 %v1922_v0, %s1872_s25 }
  0x22   :  { %319 = vrot.lane.b32.xlu0 %v1937_v3, %s1872_s25 }
  0x24   :  { %181 = vrot.lane.b32.xlu1 %v1922_v0, %s1869_s22 }
  0x26   :  { %226 = vrot.lane.b32.xlu0 %v1949_v4, %s1870_s23 }
  0x28   :  { %270 = vrot.lane.b32.xlu1 %v1922_v0, %s1871_s24 }
  0x2a   :  { %315 = vrot.lane.b32.xlu0 %v1949_v4, %s1872_s25 }
  0x2c   :  { %361 = vrot.lane.b32.xlu1 %v1933_v2, %s1873_s26 }
  0x2e   :  { %363 = vrot.lane.b32.xlu0 %v1927_v1, %s1873_s26 }
  0x30   :  { %406 = vrot.lane.b32.xlu1 %v1922_v0, %s1874_s27 }
  0x32   :  { %408 = vrot.lane.b32.xlu0 %v1937_v3, %s1874_s27 }
  0x34   :  { %450 = vrot.lane.b32.xlu1 %v1933_v2, %s1875_s28 }
  0x36   :  { %452 = vrot.lane.b32.xlu0 %v1927_v1, %s1875_s28 }
  0x38   :  { %495 = vrot.lane.b32.xlu1 %v1922_v0, %s1876_s29 }
  0x3a   :  { %497 = vrot.lane.b32.xlu0 %v1937_v3, %s1876_s29 }
  0x3c   :  { %359 = vrot.lane.b32.xlu1 %v1922_v0, %s1873_s26 }
  0x3e   :  { %404 = vrot.lane.b32.xlu0 %v1949_v4, %s1874_s27 }
  0x40   :  { %448 = vrot.lane.b32.xlu1 %v1922_v0, %s1875_s28 }
  0x42   :  { %493 = vrot.lane.b32.xlu0 %v1949_v4, %s1876_s29 }
  0x44   :  { %539 = vrot.lane.b32.xlu1 %v1933_v2, %s1877_s30 }
  0x46   :  { %541 = vrot.lane.b32.xlu0 %v1927_v1, %s1877_s30 }
  0x48   :  { %584 = vrot.lane.b32.xlu1 %v1922_v0, %s1878_s5 }
  0x4a   :  { %586 = vrot.lane.b32.xlu0 %v1937_v3, %s1878_s5 }
  0x4c   :  { %628 = vrot.lane.b32.xlu1 %v1933_v2, %s1879_s6 }
  0x4e   :  { %630 = vrot.lane.b32.xlu0 %v1927_v1, %s1879_s6 }
  0x50   :  { %673 = vrot.lane.b32.xlu1 %v1922_v0, %s1880_s7 }
  0x52   :  { %675 = vrot.lane.b32.xlu0 %v1937_v3, %s1880_s7 }
  0x54   :  { %537 = vrot.lane.b32.xlu1 %v1922_v0, %s1877_s30 }
  0x56   :  { %582 = vrot.lane.b32.xlu0 %v1949_v4, %s1878_s5 }
  0x58   :  { %626 = vrot.lane.b32.xlu1 %v1922_v0, %s1879_s6 }
  0x5a   :  { %671 = vrot.lane.b32.xlu0 %v1949_v4, %s1880_s7 }
  0x5c   :  { %717 = vrot.lane.b32.xlu1 %v1933_v2, %s1881_s8 }
  0x5e   :  { %719 = vrot.lane.b32.xlu0 %v1927_v1, %s1881_s8 }
  0x60   :  { %762 = vrot.lane.b32.xlu1 %v1922_v0, %s1882_s9 }
  0x62   :  { %764 = vrot.lane.b32.xlu0 %v1937_v3, %s1882_s9 }
  0x64   :  { %806 = vrot.lane.b32.xlu1 %v1933_v2, %s1883_s10 }
  0x66   :  { %808 = vrot.lane.b32.xlu0 %v1927_v1, %s1883_s10 }
  0x68   :  { %851 = vrot.lane.b32.xlu1 %v1922_v0, %s1884_s13 }
  0x6a   :  { %853 = vrot.lane.b32.xlu0 %v1937_v3, %s1884_s13 }
  0x6c   :  { %715 = vrot.lane.b32.xlu1 %v1922_v0, %s1881_s8 }
  0x6e   :  { %760 = vrot.lane.b32.xlu0 %v1949_v4, %s1882_s9 }
  0x70   :  { %804 = vrot.lane.b32.xlu1 %v1922_v0, %s1883_s10 }
  0x72   :  { %849 = vrot.lane.b32.xlu0 %v1949_v4, %s1884_s13 }
  0x74   :  { %54 = vrot.lane.b32.xlu1 %v1927_v1, %s1866_s19  ;;  %v51_v10 = vpop.permute.xlu0 %50 }
  0x76   :  { %v95_v11 = vpop.permute.xlu1 %94  ;;  %56 = vrot.lane.b32.xlu0 %v2067_v8, %s1866_s19 }
  0x78   :  { %98 = vrot.lane.b32.xlu1 %v2071_v9, %s1867_s20  ;;  %v2079_v12 = vpop.permute.xlu0 %52 }
  0x79   :  { %v64_v13 = vsel %vm62_vm0, %v51_v10, %v2079_v12 }
  0x7a   :  { %76 = vst [vmem:[#allocation2 + $0x8] sm:$0xf0] %v64_v13  ;;  %v2083_v14 = vpop.permute.xlu1 %96  ;;  %100 = vrot.lane.b32.xlu0 %v2059_v7, %s1867_s20 }
  0x7b   :  { %v108_v15 = vsel %vm106_vm1, %v95_v11, %v2083_v14 }
  0x7c   :  { %120 = vst [vmem:[#allocation2 + $0x38] sm:$0xf] %v108_v15  ;;  %143 = vrot.lane.b32.xlu1 %v1927_v1, %s1868_s21  ;;  %v140_v16 = vpop.permute.xlu0 %139  ;;  %v84_v15 = vld [vmem:[%s2736_s1 + $0x18] sm:$0xf] }
  0x7e   :  { %v2091_v17 = vpop.permute.xlu1 %141  ;;  %145 = vrot.lane.b32.xlu0 %v2067_v8, %s1868_s21 }
  0x7f   :  { %v153_v18 = vsel %vm151_vm2, %v140_v16, %v2091_v17 }
  0x80   :  { %165 = vst [vmem:[#allocation2 + $0x38] sm:$0xf0] %v153_v18  ;;  %895 = vrot.lane.b32.xlu1 %v1933_v2, %s1885_s16  ;;  %v49_v19 = vpop.permute.xlu0 %48 }
  0x81   :  { %v63_v20 = vsel %vm62_vm0, %v49_v19, %v51_v10  ;;  %v1106_v26 = vld [vmem:[#allocation2 + $0x8] sm:$0xff] }
  0x82   :  { %75 = vst [vmem:[#allocation2] sm:$0xf0] %v63_v20  ;;  %v93_v21 = vpop.permute.xlu1 %92  ;;  %897 = vrot.lane.b32.xlu0 %v1927_v1, %s1885_s16  ;;  %v1826_v20 = vld [vmem:[%s2736_s1 + $0x18] ss:$0 sps:$4 sm:$0xff]  }
  0x83   :  { %v107_v22 = vsel %vm106_vm1, %v93_v21, %v95_v11 }
  0x84   :  { %119 = vst [vmem:[#allocation2 + $0x30] sm:$0xf] %v107_v22  ;;  %940 = vrot.lane.b32.xlu1 %v1922_v0, %s1886_s17  ;;  %v138_v23 = vpop.permute.xlu0 %137 }
  0x85   :  { %v152_v24 = vsel %vm151_vm2, %v138_v23, %v140_v16 }
  0x86   :  { %164 = vst [vmem:[#allocation2 + $0x30] sm:$0xf0] %v152_v24  ;;  %v184_v25 = vpop.permute.xlu1 %183  ;;  %942 = vrot.lane.b32.xlu0 %v1937_v3, %s1886_s17 }
  0x87   :  { %v1112_v27 = vld [vmem:[#allocation2 + $0x38] sm:$0xff] }
  0x88   :  { %984 = vrot.lane.b32.xlu1 %v1933_v2, %s1887_s18  ;;  %v2110_v28 = vpop.permute.xlu0 %185  ;;  %v1714_v29 = vpack.c.bf16 %v1112_v27, %v1106_v26 }
  0x89   :  { %v197_v30 = vsel %vm195_vm3, %v184_v25, %v2110_v28  ;;  %v1105_v34 = vld [vmem:[#allocation2] sm:$0xff] }
  0x8a   :  { %209 = vst [vmem:[#allocation2 + $0x68] sm:$0xf] %v197_v30  ;;  %v229_v31 = vpop.permute.xlu1 %228  ;;  %986 = vrot.lane.b32.xlu0 %v1927_v1, %s1887_s18  ;;  %1715 = vmatprep.subr.bf16.mxu0 %v1714_v29 }
  0x8c   :  { %1029 = vrot.lane.b32.xlu1 %v1922_v0, %s2740_s11  ;;  %v2118_v32 = vpop.permute.xlu0 %230 }
  0x8d   :  { %v242_v33 = vsel %vm240_vm4, %v229_v31, %v2118_v32  ;;  %v1111_v35 = vld [vmem:[#allocation2 + $0x30] sm:$0xff] }
  0x8e   :  { %254 = vst [vmem:[#allocation2 + $0x68] sm:$0xf0] %v242_v33  ;;  %v273_v36 = vpop.permute.xlu1 %272  ;;  %1031 = vrot.lane.b32.xlu0 %v1937_v3, %s2740_s11  ;;  %v1716_v37 = vpack.c.bf16 %v1111_v35, %v1105_v34 }
  0x90   :  { %893 = vrot.lane.b32.xlu1 %v1922_v0, %s1885_s16  ;;  %v2126_v38 = vpop.permute.xlu0 %274  ;;  %1717 = vmatpush1.bf16.msra.mxu0 %v1716_v37 }
  0x91   :  { %v286_v39 = vsel %vm284_vm5, %v273_v36, %v2126_v38 }
  0x92   :  { %298 = vst [vmem:[#allocation2 + $0x98] sm:$0xf] %v286_v39  ;;  %v318_v40 = vpop.permute.xlu1 %317  ;;  %938 = vrot.lane.b32.xlu0 %v1949_v4, %s1886_s17 }
  0x94   :  { %982 = vrot.lane.b32.xlu1 %v1922_v0, %s1887_s18  ;;  %v2134_v41 = vpop.permute.xlu0 %319 }
  0x95   :  { %v331_v42 = vsel %vm329_vm6, %v318_v40, %v2134_v41  ;;  %v1118_v53 = vld [vmem:[#allocation2 + $0x68] sm:$0xff] }
  0x96   :  { %343 = vst [vmem:[#allocation2 + $0x98] sm:$0xf0] %v331_v42  ;;  %v182_v43 = vpop.permute.xlu1 %181  ;;  %1027 = vrot.lane.b32.xlu0 %v1949_v4, %s2740_s11 }
  0x97   :  { %v196_v44 = vsel %vm195_vm3, %v182_v43, %v184_v25 }
  0x98   :  { %208 = vst [vmem:[#allocation2 + $0x60] sm:$0xf] %v196_v44  ;;  %187 = vrot.lane.b32.xlu1 %v2071_v9, %s1869_s22  ;;  %v227_v45 = vpop.permute.xlu0 %226 }
  0x99   :  { %v241_v46 = vsel %vm240_vm4, %v227_v45, %v229_v31 }
  0x9a   :  { %253 = vst [vmem:[#allocation2 + $0x60] sm:$0xf0] %v241_v46  ;;  %v271_v47 = vpop.permute.xlu1 %270  ;;  %189 = vrot.lane.b32.xlu0 %v2059_v7, %s1869_s22 }
  0x9b   :  { %v285_v48 = vsel %vm284_vm5, %v271_v47, %v273_v36 }
  0x9c   :  { %297 = vst [vmem:[#allocation2 + $0x90] sm:$0xf] %v285_v48  ;;  %232 = vrot.lane.b32.xlu1 %v1927_v1, %s1870_s23  ;;  %v316_v50 = vpop.permute.xlu0 %315 }
  0x9d   :  { %v330_v52 = vsel %vm329_vm6, %v316_v50, %v318_v40  ;;  %v1124_v54 = vld [vmem:[#allocation2 + $0x98] sm:$0xff] }
  0x9e   :  { %342 = vst [vmem:[#allocation2 + $0x90] sm:$0xf0] %v330_v52  ;;  %v362_v55 = vpop.permute.xlu1 %361  ;;  %234 = vrot.lane.b32.xlu0 %v2067_v8, %s1870_s23  ;;  %v1718_v56 = vpack.c.bf16 %v1124_v54, %v1118_v53  ;;  %v1890_v52 = vmov 0.0  }
  0x9f   :  { %1276 = vmatprep.mubr.f32.mxu0 %v1890_v52  ;;  %1347 = vmatprep.mubr.f32.mxu1 %v1890_v52 }
  0xa0   :  { %276 = vrot.lane.b32.xlu1 %v2071_v9, %s1871_s24  ;;  %v2165_v57 = vpop.permute.xlu0 %363  ;;  %1719 = vmatprep.subr.bf16.mxu0 %v1718_v56  ;;  %v173_v56 = vld [vmem:[%s2736_s1 + $0x18] sm:$0xf] }
  0xa1   :  { %v375_v58 = vsel %vm373_vm7, %v362_v55, %v2165_v57  ;;  %v1117_v62 = vld [vmem:[#allocation2 + $0x60] sm:$0xff] }
  0xa2   :  { %387 = vst [vmem:[#allocation2 + $0xc8] sm:$0xf] %v375_v58  ;;  %v407_v59 = vpop.permute.xlu1 %406  ;;  %278 = vrot.lane.b32.xlu0 %v2059_v7, %s1871_s24 }
  0xa4   :  { %321 = vrot.lane.b32.xlu1 %v1927_v1, %s1872_s25  ;;  %v2173_v60 = vpop.permute.xlu0 %408 }
  0xa5   :  { %v420_v61 = vsel %vm418_vm8, %v407_v59, %v2173_v60  ;;  %v1123_v63 = vld [vmem:[#allocation2 + $0x90] sm:$0xff] }
  0xa6   :  { %432 = vst [vmem:[#allocation2 + $0xc8] sm:$0xf0] %v420_v61  ;;  %v451_v3 = vpop.permute.xlu1 %450  ;;  %323 = vrot.lane.b32.xlu0 %v2067_v8, %s1872_s25  ;;  %v1720_v4 = vpack.c.bf16 %v1123_v63, %v1117_v62 }
  0xa8   :  { %58 = vrot.lane.b32.xlu1 %v2059_v7, %s1866_s19  ;;  %v2188_v10 = vpop.permute.xlu0 %452  ;;  %1721 = vmatpush1.bf16.msra.mxu0 %v1720_v4 }
  0xa9   :  { %v464_v11 = vsel %vm462_vm9, %v451_v3, %v2188_v10 }
  0xaa   :  { %476 = vst [vmem:[#allocation2 + $0xf8] sm:$0xf] %v464_v11  ;;  %v496_v13 = vpop.permute.xlu1 %495  ;;  %60 = vrot.lane.b32.xlu0 %v1825_v5, %s1866_s19  ;;  %s1889_s19 = smov 44  }
  0xac   :  { %102 = vrot.lane.b32.xlu1 %v2184_v6, %s1867_s20  ;;  %v2198_v16 = vpop.permute.xlu0 %497 }
  0xad   :  { %v509_v18 = vsel %vm507_vm10, %v496_v13, %v2198_v16  ;;  %v1130_v29 = vld [vmem:[#allocation2 + $0xc8] sm:$0xff] }
  0xae   :  { %521 = vst [vmem:[#allocation2 + $0xf8] sm:$0xf0] %v509_v18  ;;  %v360_v19 = vpop.permute.xlu1 %359  ;;  %104 = vrot.lane.b32.xlu0 %v84_v15, %s1867_s20  ;;  %v262_v15 = vld [vmem:[%s2736_s1 + $0x18] sm:$0xf] }
  0xaf   :  { %v374_v21 = vsel %vm373_vm7, %v360_v19, %v362_v55 }
  0xb0   :  { %386 = vst [vmem:[#allocation2 + $0xc0] sm:$0xf] %v374_v21  ;;  %147 = vrot.lane.b32.xlu1 %v2059_v7, %s1868_s21  ;;  %v405_v22 = vpop.permute.xlu0 %404 }
  0xb1   :  { %v419_v23 = vsel %vm418_vm8, %v405_v22, %v407_v59 }
  0xb2   :  { %431 = vst [vmem:[#allocation2 + $0xc0] sm:$0xf0] %v419_v23  ;;  %v449_v24 = vpop.permute.xlu1 %448  ;;  %149 = vrot.lane.b32.xlu0 %v1826_v20, %s1868_s21  ;;  %v1828_v20 = vld [vmem:[%s2736_s1 + $0x18] ss:$0 sps:$4 sm:$0xff]  }
  0xb3   :  { %v463_v25 = vsel %vm462_vm9, %v449_v24, %v451_v3 }
  0xb4   :  { %475 = vst [vmem:[#allocation2 + $0xf0] sm:$0xf] %v463_v25  ;;  %365 = vrot.lane.b32.xlu1 %v2071_v9, %s1873_s26  ;;  %v494_v26 = vpop.permute.xlu0 %493 }
  0xb5   :  { %v508_v27 = vsel %vm507_vm10, %v494_v26, %v496_v13  ;;  %v1136_v30 = vld [vmem:[#allocation2 + $0xf8] sm:$0xff] }
  0xb6   :  { %520 = vst [vmem:[#allocation2 + $0xf0] sm:$0xf0] %v508_v27  ;;  %v540_v31 = vpop.permute.xlu1 %539  ;;  %367 = vrot.lane.b32.xlu0 %v2059_v7, %s1873_s26  ;;  %v1722_v33 = vpack.c.bf16 %v1136_v30, %v1130_v29 }
  0xb8   :  { %410 = vrot.lane.b32.xlu1 %v1927_v1, %s1874_s27  ;;  %v2219_v34 = vpop.permute.xlu0 %541  ;;  %1723 = vmatprep.subr.bf16.mxu0 %v1722_v33 }
  0xb9   :  { %v553_v35 = vsel %vm551_vm11, %v540_v31, %v2219_v34  ;;  %v1129_v40 = vld [vmem:[#allocation2 + $0xc0] sm:$0xff] }
  0xba   :  { %565 = vst [vmem:[#allocation2 + $0x128] sm:$0xf] %v553_v35  ;;  %v585_v36 = vpop.permute.xlu1 %584  ;;  %412 = vrot.lane.b32.xlu0 %v2067_v8, %s1874_s27 }
  0xbc   :  { %454 = vrot.lane.b32.xlu1 %v2071_v9, %s1875_s28  ;;  %v2227_v37 = vpop.permute.xlu0 %586 }
  0xbd   :  { %v598_v39 = vsel %vm2744_vm12, %v585_v36, %v2227_v37  ;;  %v1135_v42 = vld [vmem:[#allocation2 + $0xf0] sm:$0xff] }
  0xbe   :  { %610 = vst [vmem:[#allocation2 + $0x128] sm:$0xf0] %v598_v39  ;;  %v629_v43 = vpop.permute.xlu1 %628  ;;  %456 = vrot.lane.b32.xlu0 %v2059_v7, %s1875_s28  ;;  %v1724_v44 = vpack.c.bf16 %v1135_v42, %v1129_v40 }
  0xc0   :  { %499 = vrot.lane.b32.xlu1 %v1927_v1, %s1876_s29  ;;  %v2235_v45 = vpop.permute.xlu0 %630  ;;  %1725 = vmatpush1.bf16.msra.mxu0 %v1724_v44 }
  0xc1   :  { %v642_v46 = vsel %vm2743_vm13, %v629_v43, %v2235_v45 }
  0xc2   :  { %654 = vst [vmem:[#allocation2 + $0x158] sm:$0xf] %v642_v46  ;;  %v674_v47 = vpop.permute.xlu1 %673  ;;  %501 = vrot.lane.b32.xlu0 %v2067_v8, %s1876_s29 }
  0xc4   :  { %1073 = vrot.lane.b32.xlu1 %v1933_v2, %s1889_s19  ;;  %v2243_v48 = vpop.permute.xlu0 %675 }
  0xc5   :  { %v687_v50 = vsel %vm2742_vm14, %v674_v47, %v2243_v48  ;;  %v1142_v63 = vld [vmem:[#allocation2 + $0x128] sm:$0xff] }
  0xc6   :  { %699 = vst [vmem:[#allocation2 + $0x158] sm:$0xf0] %v687_v50  ;;  %v538_v53 = vpop.permute.xlu1 %537  ;;  %1075 = vrot.lane.b32.xlu0 %v1927_v1, %s1889_s19 }
  0xc7   :  { %v552_v54 = vsel %vm551_vm11, %v538_v53, %v540_v31 }
  0xc8   :  { %564 = vst [vmem:[#allocation2 + $0x120] sm:$0xf] %v552_v54  ;;  %1071 = vrot.lane.b32.xlu1 %v1922_v0, %s1889_s19  ;;  %v583_v2 = vpop.permute.xlu0 %582  ;;  %v1827_v0 = vld [vmem:[%s2736_s1 + $0x18] ss:$0 sps:$4 sm:$0xff]  }
  0xc9   :  { %v597_v55 = vsel %vm2744_vm12, %v583_v2, %v585_v36  ;;  %vm2745_vm12 = vcmask 523264  }
  0xca   :  { %609 = vst [vmem:[#allocation2 + $0x120] sm:$0xf0] %v597_v55  ;;  %v627_v58 = vpop.permute.xlu1 %626  ;;  %191 = vrot.lane.b32.xlu0 %v2184_v6, %s1869_s22 }
  0xcb   :  { %v641_v59 = vsel %vm2743_vm13, %v627_v58, %v629_v43  ;;  %vm2746_vm13 = vcmask 531456  }
  0xcc   :  { %653 = vst [vmem:[#allocation2 + $0x150] sm:$0xf] %v641_v59  ;;  %193 = vrot.lane.b32.xlu1 %v173_v56, %s1869_s22  ;;  %v672_v61 = vpop.permute.xlu0 %671  ;;  %v351_v56 = vld [vmem:[%s2736_s1 + $0x18] sm:$0xf] }
  0xcd   :  { %v686_v62 = vsel %vm2742_vm14, %v672_v61, %v674_v47  ;;  %v1148_v3 = vld [vmem:[#allocation2 + $0x158] sm:$0xff]  ;;  %vm2747_vm14 = vcmask 539648  }
  0xce   :  { %698 = vst [vmem:[#allocation2 + $0x150] sm:$0xf0] %v686_v62  ;;  %v718_v4 = vpop.permute.xlu1 %717  ;;  %236 = vrot.lane.b32.xlu0 %v2059_v7, %s1870_s23  ;;  %v1726_v5 = vpack.c.bf16 %v1148_v3, %v1142_v63  ;;  %v1829_v61 = vld [vmem:[%s2736_s1 + $0x18] ss:$0 sps:$4 sm:$0xff]  }
  0xd0   :  { %238 = vrot.lane.b32.xlu1 %v1827_v0, %s1870_s23  ;;  %v2269_v11 = vpop.permute.xlu0 %719  ;;  %1727 = vmatprep.subr.bf16.mxu0 %v1726_v5 }
  0xd1   :  { %v731_v13 = vsel %vm2748_vm15, %v718_v4, %v2269_v11  ;;  %v1141_v22 = vld [vmem:[#allocation2 + $0x120] sm:$0xff] }
  0xd2   :  { %743 = vst [vmem:[#allocation2 + $0x188] sm:$0xf] %v731_v13  ;;  %v763_v18 = vpop.permute.xlu1 %762  ;;  %280 = vrot.lane.b32.xlu0 %v2184_v6, %s1871_s24 }
  0xd4   :  { %282 = vrot.lane.b32.xlu1 %v262_v15, %s1871_s24  ;;  %v2279_v19 = vpop.permute.xlu0 %764  ;;  %v440_v15 = vld [vmem:[%s2736_s1 + $0x18] sm:$0xf]  ;;  %s2749_s24 = smov 45  }
  0xd5   :  { %v776_v21 = vsel %vm2747_vm14, %v763_v18, %v2279_v19  ;;  %v1147_v23 = vld [vmem:[#allocation2 + $0x150] sm:$0xff] }
  0xd6   :  { %788 = vst [vmem:[#allocation2 + $0x188] sm:$0xf0] %v776_v21  ;;  %v807_v24 = vpop.permute.xlu1 %806  ;;  %325 = vrot.lane.b32.xlu0 %v2059_v7, %s1872_s25  ;;  %v1728_v25 = vpack.c.bf16 %v1147_v23, %v1141_v22 }
  0xd8   :  { %327 = vrot.lane.b32.xlu1 %v1828_v20, %s1872_s25  ;;  %v2289_v26 = vpop.permute.xlu0 %808  ;;  %1729 = vmatpush1.bf16.msra.mxu0 %v1728_v25  ;;  %v1830_v20 = vld [vmem:[%s2736_s1 + $0x18] ss:$0 sps:$4 sm:$0xff]  }
  0xd9   :  { %v820_v27 = vsel %vm2746_vm13, %v807_v24, %v2289_v26 }
  0xda   :  { %832 = vst [vmem:[#allocation2 + $0x1b8] sm:$0xf] %v820_v27  ;;  %v852_v29 = vpop.permute.xlu1 %851  ;;  %543 = vrot.lane.b32.xlu0 %v2071_v9, %s1877_s30 }
  0xdc   :  { %545 = vrot.lane.b32.xlu1 %v2059_v7, %s1877_s30  ;;  %v2297_v30 = vpop.permute.xlu0 %853 }
  0xdd   :  { %v865_v31 = vsel %vm2745_vm12, %v852_v29, %v2297_v30  ;;  %v1154_v46 = vld [vmem:[#allocation2 + $0x188] sm:$0xff] }
  0xde   :  { %877 = vst [vmem:[#allocation2 + $0x1b8] sm:$0xf0] %v865_v31  ;;  %v716_v33 = vpop.permute.xlu1 %715  ;;  %588 = vrot.lane.b32.xlu0 %v1927_v1, %s1878_s5 }
  0xdf   :  { %v730_v35 = vsel %vm2748_vm15, %v716_v33, %v718_v4  ;;  %vm1041_vm15 = vcmask 367616  }
  0xe0   :  { %742 = vst [vmem:[#allocation2 + $0x180] sm:$0xf] %v730_v35  ;;  %590 = vrot.lane.b32.xlu1 %v2067_v8, %s1878_s5  ;;  %v761_v36 = vpop.permute.xlu0 %760 }
  0xe1   :  { %v775_v39 = vsel %vm2747_vm14, %v761_v36, %v763_v18  ;;  %vm996_vm14 = vcmask 375808  }
  0xe2   :  { %787 = vst [vmem:[#allocation2 + $0x180] sm:$0xf0] %v775_v39  ;;  %v805_v40 = vpop.permute.xlu1 %804  ;;  %632 = vrot.lane.b32.xlu0 %v2071_v9, %s1879_s6 }
  0xe3   :  { %v819_v42 = vsel %vm2746_vm13, %v805_v40, %v807_v24  ;;  %vm952_vm13 = vcmask 384000  }
  0xe4   :  { %831 = vst [vmem:[#allocation2 + $0x1b0] sm:$0xf] %v819_v42  ;;  %634 = vrot.lane.b32.xlu1 %v2059_v7, %s1879_s6  ;;  %v850_v43 = vpop.permute.xlu0 %849 }
  0xe5   :  { %v864_v44 = vsel %vm2745_vm12, %v850_v43, %v852_v29  ;;  %v1160_v47 = vld [vmem:[#allocation2 + $0x1b8] sm:$0xff]  ;;  %vm907_vm12 = vcmask 392192  }
  0xe6   :  { %876 = vst [vmem:[#allocation2 + $0x1b0] sm:$0xf0] %v864_v44  ;;  %v55_v50 = vpop.permute.xlu1 %54  ;;  %677 = vrot.lane.b32.xlu0 %v1927_v1, %s1880_s7  ;;  %v1730_v53 = vpack.c.bf16 %v1160_v47, %v1154_v46 }
  0xe7   :  { %v65_v54 = vsel %vm62_vm0, %v2079_v12, %v55_v50 }
  0xe8   :  { %77 = vst [vmem:[#allocation2 + $0x10] sm:$0xf0] %v65_v54  ;;  %679 = vrot.lane.b32.xlu1 %v2067_v8, %s1880_s7  ;;  %v2319_v2 = vpop.permute.xlu0 %56  ;;  %1731 = vmatprep.subr.bf16.mxu0 %v1730_v53 }
  0xe9   :  { %v66_v55 = vsel %vm62_vm0, %v55_v50, %v2319_v2  ;;  %v1153_v62 = vld [vmem:[#allocation2 + $0x180] sm:$0xff] }
  0xea   :  { %78 = vst [vmem:[#allocation2 + $0x18] sm:$0xf0] %v66_v55  ;;  %v99_v58 = vpop.permute.xlu1 %98  ;;  %369 = vrot.lane.b32.xlu0 %v2184_v6, %s1873_s26 }
  0xeb   :  { %v109_v12 = vsel %vm106_vm1, %v2083_v14, %v99_v58 }
  0xec   :  { %121 = vst [vmem:[#allocation2 + $0x40] sm:$0xf] %v109_v12  ;;  %371 = vrot.lane.b32.xlu1 %v351_v56, %s1873_s26  ;;  %v2331_v59 = vpop.permute.xlu0 %100  ;;  %v529_v12 = vld [vmem:[%s2736_s1 + $0x18] sm:$0xf] }
  0xed   :  { %v110_v0 = vsel %vm106_vm1, %v99_v58, %v2331_v59  ;;  %v1159_v63 = vld [vmem:[#allocation2 + $0x1b0] sm:$0xff] }
  0xee   :  { %122 = vst [vmem:[#allocation2 + $0x48] sm:$0xf] %v110_v0  ;;  %v144_v3 = vpop.permute.xlu1 %143  ;;  %414 = vrot.lane.b32.xlu0 %v2059_v7, %s1874_s27  ;;  %v1732_v14 = vpack.c.bf16 %v1159_v63, %v1153_v62 }
  0xef   :  { %v154_v4 = vsel %vm151_vm2, %v2091_v17, %v144_v3  ;;  %v1107_v35 = vld [vmem:[#allocation2 + $0x10] sm:$0xff] }
  0xf0   :  { %166 = vst [vmem:[#allocation2 + $0x40] sm:$0xf0] %v154_v4  ;;  %416 = vrot.lane.b32.xlu1 %v1829_v61, %s1874_s27  ;;  %v2343_v5 = vpop.permute.xlu0 %145  ;;  %1733 = vmatpush1.bf16.msra.mxu0 %v1732_v14  ;;  %v1832_v4 = vld [vmem:[%s2736_s1 + $0x18] ss:$0 sps:$4 sm:$0xff]  }
  0xf1   :  { %v155_v13 = vsel %vm151_vm2, %v144_v3, %v2343_v5  ;;  %v1108_v27 = vld [vmem:[#allocation2 + $0x18] sm:$0xff] }
  0xf2   :  { %167 = vst [vmem:[#allocation2 + $0x48] sm:$0xf0] %v155_v13  ;;  %v896_v18 = vpop.permute.xlu1 %895  ;;  %458 = vrot.lane.b32.xlu0 %v2184_v6, %s1875_s28 }
  0xf4   :  { %460 = vrot.lane.b32.xlu1 %v440_v15, %s1875_s28  ;;  %v2353_v17 = vpop.permute.xlu0 %897 }
  0xf5   :  { %v909_v21 = vsel %vm907_vm12, %v896_v18, %v2353_v17 }
  0xf6   :  { %921 = vst [vmem:[#allocation2 + $0x1e8] sm:$0xf] %v909_v21  ;;  %v941_v22 = vpop.permute.xlu1 %940  ;;  %503 = vrot.lane.b32.xlu0 %v2059_v7, %s1876_s29  ;;  %v618_v21 = vld [vmem:[%s2736_s1 + $0x18] sm:$0xf] }
  0xf7   :  { %v1113_v24 = vld [vmem:[#allocation2 + $0x40] sm:$0xff] }
  0xf8   :  { %505 = vrot.lane.b32.xlu1 %v1830_v20, %s1876_s29  ;;  %v2363_v23 = vpop.permute.xlu0 %942  ;;  %v1740_v36 = vpack.c.bf16 %v1113_v24, %v1107_v35 }
  0xf9   :  { %v954_v25 = vsel %vm952_vm13, %v941_v22, %v2363_v23  ;;  %v1114_v29 = vld [vmem:[#allocation2 + $0x48] sm:$0xff] }
  0xfa   :  { %966 = vst [vmem:[#allocation2 + $0x1e8] sm:$0xf0] %v954_v25  ;;  %v985_v31 = vpop.permute.xlu1 %984  ;;  %721 = vrot.lane.b32.xlu0 %v2071_v9, %s1881_s8  ;;  %v1738_v33 = vpack.c.bf16 %v1114_v29, %v1108_v27 }
  0xfc   :  { %723 = vrot.lane.b32.xlu1 %v2059_v7, %s1881_s8  ;;  %v2371_v39 = vpop.permute.xlu0 %986  ;;  %1739 = vmatprep.subr.bf16.mxu1 %v1738_v33 }
  0xfd   :  { %v998_v40 = vsel %vm996_vm14, %v985_v31, %v2371_v39  ;;  %1741 = vmatpush1.bf16.msra.mxu1 %v1740_v36 }
  0xfe   :  { %1010 = vst [vmem:[#allocation2 + $0x218] sm:$0xf] %v998_v40  ;;  %v1030_v42 = vpop.permute.xlu1 %1029  ;;  %766 = vrot.lane.b32.xlu0 %v1927_v1, %s1882_s9 }
 0x100   :  { %768 = vrot.lane.b32.xlu1 %v2067_v8, %s1882_s9  ;;  %v2379_v43 = vpop.permute.xlu0 %1031 }
 0x101   :  { %v1043_v44 = vsel %vm1041_vm15, %v1030_v42, %v2379_v43  ;;  %v1166_v61 = vld [vmem:[#allocation2 + $0x1e8] sm:$0xff] }
 0x102   :  { %1055 = vst [vmem:[#allocation2 + $0x218] sm:$0xf0] %v1043_v44  ;;  %v894_v46 = vpop.permute.xlu1 %893  ;;  %810 = vrot.lane.b32.xlu0 %v2071_v9, %s1883_s10 }
 0x103   :  { %v908_v47 = vsel %vm907_vm12, %v894_v46, %v896_v18 }
 0x104   :  { %920 = vst [vmem:[#allocation2 + $0x1e0] sm:$0xf] %v908_v47  ;;  %812 = vrot.lane.b32.xlu1 %v2059_v7, %s1883_s10  ;;  %v939_v50 = vpop.permute.xlu0 %938 }
 0x105   :  { %v953_v53 = vsel %vm952_vm13, %v939_v50, %v941_v22 }
 0x106   :  { %965 = vst [vmem:[#allocation2 + $0x1e0] sm:$0xf0] %v953_v53  ;;  %v983_v54 = vpop.permute.xlu1 %982  ;;  %855 = vrot.lane.b32.xlu0 %v1927_v1, %s1884_s13 }
 0x107   :  { %v997_v55 = vsel %vm996_vm14, %v983_v54, %v985_v31  ;;  %v1833_v31 = vld [vmem:[%s2736_s1 + $0x18] ss:$0 sps:$4 sm:$0xff]  }
 0x108   :  { %1009 = vst [vmem:[#allocation2 + $0x210] sm:$0xf] %v997_v55  ;;  %857 = vrot.lane.b32.xlu1 %v2067_v8, %s1884_s13  ;;  %v1028_v56 = vpop.permute.xlu0 %1027 }
 0x109   :  { %v1042_v58 = vsel %vm1041_vm15, %v1028_v56, %v1030_v42  ;;  %v1172_v0 = vld [vmem:[#allocation2 + $0x218] sm:$0xff] }
 0x10a   :  { %1054 = vst [vmem:[#allocation2 + $0x210] sm:$0xf0] %v1042_v58  ;;  %v188_v62 = vpop.permute.xlu1 %187  ;;  %547 = vrot.lane.b32.xlu0 %v2184_v6, %s1877_s30  ;;  %v1734_v63 = vpack.c.bf16 %v1172_v0, %v1166_v61 }
 0x10b   :  { %v198_v3 = vsel %vm195_vm3, %v2110_v28, %v188_v62 }
 0x10c   :  { %210 = vst [vmem:[#allocation2 + $0x70] sm:$0xf] %v198_v3  ;;  %549 = vrot.lane.b32.xlu1 %v529_v12, %s1877_s30  ;;  %v2403_v14 = vpop.permute.xlu0 %189  ;;  %1735 = vmatprep.subr.bf16.mxu0 %v1734_v63  ;;  %v1840_v3 = vld [vmem:[%s2736_s1 + $0x8] sm:$0xff] }
 0x10d   :  { %v199_v13 = vsel %vm195_vm3, %v188_v62, %v2403_v14  ;;  %v1165_v22 = vld [vmem:[#allocation2 + $0x1e0] sm:$0xff] }
 0x10e   :  { %211 = vst [vmem:[#allocation2 + $0x78] sm:$0xf] %v199_v13  ;;  %v233_v15 = vpop.permute.xlu1 %232  ;;  %592 = vrot.lane.b32.xlu0 %v2059_v7, %s1878_s5 }
 0x10f   :  { %v243_v28 = vsel %vm240_vm4, %v2118_v32, %v233_v15 }
 0x110   :  { %255 = vst [vmem:[#allocation2 + $0x70] sm:$0xf0] %v243_v28  ;;  %594 = vrot.lane.b32.xlu1 %v1832_v4, %s1878_s5  ;;  %v2415_v18 = vpop.permute.xlu0 %234 }
 0x111   :  { %v244_v20 = vsel %vm240_vm4, %v233_v15, %v2415_v18  ;;  %v1171_v24 = vld [vmem:[#allocation2 + $0x210] sm:$0xff]  ;;  %v707_v15 = vld [vmem:[%s2736_s1 + $0x18] sm:$0xf] }
 0x112   :  { %256 = vst [vmem:[#allocation2 + $0x78] sm:$0xf0] %v244_v20  ;;  %v277_v25 = vpop.permute.xlu1 %276  ;;  %636 = vrot.lane.b32.xlu0 %v2184_v6, %s1879_s6  ;;  %v1736_v32 = vpack.c.bf16 %v1171_v24, %v1165_v22  ;;  %v1834_v20 = vld [vmem:[%s2736_s1 + $0x18] ss:$0 sps:$4 sm:$0xff]  }
 0x113   :  { %v287_v27 = vsel %vm284_vm5, %v2126_v38, %v277_v25 }
 0x114   :  { %299 = vst [vmem:[#allocation2 + $0xa0] sm:$0xf] %v287_v27  ;;  %638 = vrot.lane.b32.xlu1 %v618_v21, %s1879_s6  ;;  %v2427_v29 = vpop.permute.xlu0 %278  ;;  %1737 = vmatpush1.bf16.msra.mxu0 %v1736_v32  ;;  %v796_v32 = vld [vmem:[%s2736_s1 + $0x18] sm:$0xf] }
 0x115   :  { %v288_v33 = vsel %vm284_vm5, %v277_v25, %v2427_v29 }
 0x116   :  { %300 = vst [vmem:[#allocation2 + $0xa8] sm:$0xf] %v288_v33  ;;  %v322_v35 = vpop.permute.xlu1 %321  ;;  %681 = vrot.lane.b32.xlu0 %v2059_v7, %s1880_s7  ;;  %v1835_v33 = vld [vmem:[%s2736_s1 + $0x18] ss:$0 sps:$4 sm:$0xff]  }
 0x117   :  { %v332_v38 = vsel %vm329_vm6, %v2134_v41, %v322_v35 }
 0x118   :  { %344 = vst [vmem:[#allocation2 + $0xa0] sm:$0xf0] %v332_v38  ;;  %683 = vrot.lane.b32.xlu1 %v1833_v31, %s1880_s7  ;;  %v2439_v36 = vpop.permute.xlu0 %323 }
 0x119   :  { %v333_v40 = vsel %vm329_vm6, %v322_v35, %v2439_v36  ;;  %v1120_v55 = vld [vmem:[#allocation2 + $0x78] sm:$0xff] }
 0x11a   :  { %345 = vst [vmem:[#allocation2 + $0xa8] sm:$0xf0] %v333_v40  ;;  %v59_v42 = vpop.permute.xlu1 %58  ;;  %899 = vrot.lane.b32.xlu0 %v2071_v9, %s1885_s16 }
 0x11b   :  { %v67_v44 = vsel %vm62_vm0, %v2319_v2, %v59_v42 }
 0x11c   :  { %79 = vst [vmem:[#allocation2 + $0x20] sm:$0xf0] %v67_v44  ;;  %901 = vrot.lane.b32.xlu1 %v2059_v7, %s1885_s16  ;;  %v61_v41 = vpop.permute.xlu0 %60 }
 0x11d   :  { %v68_v46 = vsel %vm62_vm0, %v59_v42, %v61_v41  ;;  %vm1085_vm0 = vcmask 359424  }
 0x11e   :  { %80 = vst [vmem:[#allocation2 + $0x28] sm:$0xf0] %v68_v46  ;;  %v103_v47 = vpop.permute.xlu1 %102  ;;  %944 = vrot.lane.b32.xlu0 %v1927_v1, %s1886_s17  ;;  %v1119_v1 = vld [vmem:[#allocation2 + $0x70] sm:$0xff] }
 0x11f   :  { %v111_v50 = vsel %vm106_vm1, %v2331_v59, %v103_v47  ;;  %v1125_v53 = vld [vmem:[#allocation2 + $0xa0] sm:$0xff] }
 0x120   :  { %123 = vst [vmem:[#allocation2 + $0x50] sm:$0xf] %v111_v50  ;;  %946 = vrot.lane.b32.xlu1 %v2067_v8, %s1886_s17  ;;  %v105_v2 = vpop.permute.xlu0 %104  ;;  %v1744_v61 = vpack.c.bf16 %v1125_v53, %v1119_v1  ;;  %v885_v50 = vld [vmem:[%s2736_s1 + $0x18] sm:$0xf] }
 0x121   :  { %v112_v54 = vsel %vm106_vm1, %v103_v47, %v105_v2  ;;  %v1126_v56 = vld [vmem:[#allocation2 + $0xa8] sm:$0xff]  ;;  %vm1193_vm1 = vcmask 1043456  }
 0x122   :  { %124 = vst [vmem:[#allocation2 + $0x58] sm:$0xf] %v112_v54  ;;  %v148_v58 = vpop.permute.xlu1 %147  ;;  %988 = vrot.lane.b32.xlu0 %v2071_v9, %s1887_s18  ;;  %v1742_v12 = vpack.c.bf16 %v1126_v56, %v1120_v55 }
 0x123   :  { %v156_v59 = vsel %vm151_vm2, %v2343_v5, %v148_v58 }
 0x124   :  { %168 = vst [vmem:[#allocation2 + $0x50] sm:$0xf0] %v156_v59  ;;  %990 = vrot.lane.b32.xlu1 %v2059_v7, %s1887_s18  ;;  %v150_v0 = vpop.permute.xlu0 %149  ;;  %1743 = vmatprep.subr.bf16.mxu1 %v1742_v12 }
 0x125   :  { %v157_v62 = vsel %vm151_vm2, %v148_v58, %v150_v0  ;;  %1745 = vmatpush1.bf16.msra.mxu1 %v1744_v61  ;;  %v1837_v58 = vld [vmem:[%s2736_s1 + $0x18] ss:$0 sps:$4 sm:$0xff]   ;;  %vm1189_vm2 = vcmask 818176  }
 0x126   :  { %169 = vst [vmem:[#allocation2 + $0x58] sm:$0xf0] %v157_v62  ;;  %v366_v63 = vpop.permute.xlu1 %365  ;;  %1033 = vrot.lane.b32.xlu0 %v1840_v3, %s2749_s24  ;;  %v1110_v62 = vld [vmem:[#allocation2 + $0x28] sm:$0xff] }
 0x127   :  { %v376_v5 = vsel %vm373_vm7, %v2165_v57, %v366_v63 }
 0x128   :  { %388 = vst [vmem:[#allocation2 + $0xd0] sm:$0xf] %v376_v5  ;;  %1035 = vrot.lane.b32.xlu1 %v2067_v8, %s2749_s24  ;;  %v2472_v4 = vpop.permute.xlu0 %367 }
 0x129   :  { %v377_v13 = vsel %vm373_vm7, %v366_v63, %v2472_v4  ;;  %v2547_v63 = vld [vmem:[%s2735_s0] sm:$0xff] }
 0x12a   :  { %389 = vst [vmem:[#allocation2 + $0xd8] sm:$0xf] %v377_v13  ;;  %v411_v28 = vpop.permute.xlu1 %410  ;;  %725 = vrot.lane.b32.xlu0 %v2184_v6, %s1881_s8  ;;  %v1109_v13 = vld [vmem:[#allocation2 + $0x20] sm:$0xff] }
 0x12b   :  { %v421_v57 = vsel %vm418_vm8, %v2173_v60, %v411_v28  ;;  %v1115_v61 = vld [vmem:[#allocation2 + $0x50] sm:$0xff] }
 0x12c   :  { %433 = vst [vmem:[#allocation2 + $0xd0] sm:$0xf0] %v421_v57  ;;  %727 = vrot.lane.b32.xlu1 %v707_v15, %s1881_s8  ;;  %v2484_v8 = vpop.permute.xlu0 %412  ;;  %v974_v57 = vld [vmem:[%s2736_s1 + $0x18] sm:$0xf] }
 0x12d   :  { %v422_v21 = vsel %vm418_vm8, %v411_v28, %v2484_v8  ;;  %v1116_v12 = vld [vmem:[#allocation2 + $0x58] sm:$0xff] }
 0x12e   :  { %434 = vst [vmem:[#allocation2 + $0xd8] sm:$0xf0] %v422_v21  ;;  %v455_v22 = vpop.permute.xlu1 %454  ;;  %770 = vrot.lane.b32.xlu0 %v2059_v7, %s1882_s9  ;;  %v1762_v5 = vpack.c.bf16 %v1116_v12, %v1110_v62 }
 0x12f   :  { %v465_v60 = vsel %vm462_vm9, %v2188_v10, %v455_v22 }
 0x130   :  { %477 = vst [vmem:[#allocation2 + $0x100] sm:$0xf] %v465_v60  ;;  %772 = vrot.lane.b32.xlu1 %v1834_v20, %s1882_s9  ;;  %v2496_v24 = vpop.permute.xlu0 %456 }
 0x131   :  { %v466_v25 = vsel %vm462_vm9, %v455_v22, %v2496_v24  ;;  %v1838_v22 = vld [vmem:[%s2736_s1 + $0x18] ss:$0 sps:$4 sm:$0xff]  }
 0x132   :  { %478 = vst [vmem:[#allocation2 + $0x108] sm:$0xf] %v466_v25  ;;  %v500_v27 = vpop.permute.xlu1 %499  ;;  %814 = vrot.lane.b32.xlu0 %v2184_v6, %s1883_s10 }
 0x133   :  { %v510_v10 = vsel %vm507_vm10, %v2198_v16, %v500_v27  ;;  %v1131_v55 = vld [vmem:[#allocation2 + $0xd0] sm:$0xff] }
 0x134   :  { %522 = vst [vmem:[#allocation2 + $0x100] sm:$0xf0] %v510_v10  ;;  %816 = vrot.lane.b32.xlu1 %v796_v32, %s1883_s10  ;;  %v2508_v31 = vpop.permute.xlu0 %501 }
 0x135   :  { %v511_v35 = vsel %vm507_vm10, %v500_v27, %v2508_v31  ;;  %v1132_v2 = vld [vmem:[#allocation2 + $0xd8] sm:$0xff] }
 0x136   :  { %523 = vst [vmem:[#allocation2 + $0x108] sm:$0xf0] %v511_v35  ;;  %v1074_v38 = vpop.permute.xlu1 %1073  ;;  %859 = vrot.lane.b32.xlu0 %v2059_v7, %s1884_s13 }
 0x138   :  { %861 = vrot.lane.b32.xlu1 %v1835_v33, %s1884_s13  ;;  %v2518_v16 = vpop.permute.xlu0 %1075 }
 0x139   :  { %v1087_v40 = vsel %vm1085_vm0, %v1074_v38, %v2518_v16 }
 0x13a   :  { %1099 = vst [vmem:[#allocation2 + $0x248] sm:$0xf] %v1087_v40  ;;  %v1072_v42 = vpop.permute.xlu1 %1071  ;;  %1077 = vrot.lane.b32.xlu0 %v2071_v9, %s1889_s19  ;;  %v1891_v40 = vmov 0  }
 0x13b   :  { %v1086_v44 = vsel %vm1085_vm0, %v1072_v42, %v1074_v38  ;;  %v1137_v46 = vld [vmem:[#allocation2 + $0x100] sm:$0xff]  ;;  %1818 = vset.pattern.permute.xlu0 %v1891_v40 }
 0x13c   :  { %1098 = vst [vmem:[#allocation2 + $0x240] sm:$0xf] %v1086_v44  ;;  %1079 = vrot.lane.b32.xlu1 %v2150_v49, %s1889_s19  ;;  %v192_v41 = vpop.permute.xlu0 %191  ;;  %v1748_v56 = vpack.c.bf16 %v1137_v46, %v1131_v55 }
 0x13d   :  { %v200_v47 = vsel %vm195_vm3, %v2403_v14, %v192_v41  ;;  %v1138_v53 = vld [vmem:[#allocation2 + $0x108] sm:$0xff] }
 0x13e   :  { %212 = vst [vmem:[#allocation2 + $0x80] sm:$0xf] %v200_v47  ;;  %v194_v54 = vpop.permute.xlu1 %193  ;;  %903 = vrot.lane.b32.xlu0 %v2184_v6, %s1885_s16  ;;  %v1746_v9 = vpack.c.bf16 %v1138_v53, %v1132_v2 }
 0x13f   :  { %v201_v49 = vsel %vm195_vm3, %v192_v41, %v194_v54  ;;  %vm2750_vm3 = vcmask 695296  }
 0x140   :  { %213 = vst [vmem:[#allocation2 + $0x88] sm:$0xf] %v201_v49  ;;  %905 = vrot.lane.b32.xlu1 %v885_v50, %s1885_s16  ;;  %v237_v14 = vpop.permute.xlu0 %236  ;;  %1747 = vmatprep.subr.bf16.mxu1 %v1746_v9 }
 0x141   :  { %v245_v1 = vsel %vm240_vm4, %v2415_v18, %v237_v14  ;;  %1749 = vmatpush1.bf16.msra.mxu1 %v1748_v56  ;;  %v1178_v59 = vld [vmem:[#allocation2 + $0x248] sm:$0xf] }
 0x142   :  { %257 = vst [vmem:[#allocation2 + $0x80] sm:$0xf0] %v245_v1  ;;  %v239_v0 = vpop.permute.xlu1 %238  ;;  %948 = vrot.lane.b32.xlu0 %v2059_v7, %s1886_s17  ;;  %1704 = vmatprep.subr.msk.mxu0 %vm1193_vm1, %v1178_v59  ;;  %v1764_v7 = vpack.c.bf16 %v1115_v61, %v1109_v13 }
 0x143   :  { %v246_v3 = vsel %vm240_vm4, %v237_v14, %v239_v0  ;;  %v1177_v18 = vld [vmem:[#allocation2 + $0x240] sm:$0xf]  ;;  %vm2751_vm4 = vmmov %vm2750_vm3 }
 0x144   :  { %258 = vst [vmem:[#allocation2 + $0x88] sm:$0xf0] %v246_v3  ;;  %950 = vrot.lane.b32.xlu1 %v1837_v58, %s1886_s17  ;;  %v281_v15 = vpop.permute.xlu0 %280  ;;  %1705 = vmatpush1.msk.msra.mxu0 %vm1193_vm1, %v1177_v18 }
 0x145   :  { %v289_v28 = vsel %vm284_vm5, %v2427_v29, %v281_v15  ;;  %1763 = vmatprep.subr.bf16.mxu0 %v1762_v5  ;;  %1706 = vmatmul.mubr.msk.f32.vlgmr.msra.gmra.mrb[0].mxu0 %vm1189_vm2, %v2547_v63 }
 0x146   :  { %301 = vst [vmem:[#allocation2 + $0xb0] sm:$0xf] %v289_v28  ;;  %v283_v20 = vpop.permute.xlu1 %282  ;;  %992 = vrot.lane.b32.xlu0 %v2184_v6, %s1887_s18  ;;  %1765 = vmatpush1.bf16.msra.mxu0 %v1764_v7  ;;  %v1841_v6 = vld [vmem:[%s2736_s1 + $0x10] sm:$0xff] }
 0x147   :  { %v290_v21 = vsel %vm284_vm5, %v281_v15, %v283_v20  ;;  %1418 = vmatprep.mubr.f32.mxu0 %v1890_v52  ;;  %vm2752_vm5 = vcmask 687104  }
 0x148   :  { %302 = vst [vmem:[#allocation2 + $0xb8] sm:$0xf] %v290_v21  ;;  %994 = vrot.lane.b32.xlu1 %v974_v57, %s1887_s18  ;;  %v326_v29 = vpop.permute.xlu0 %325 }
 0x149   :  { %v334_v60 = vsel %vm329_vm6, %v2439_v36, %v326_v29  ;;  %v1063_v36 = vld [vmem:[%s2736_s1 + $0x18] sm:$0xf]  ;;  %v1121_v2 = vld [vmem:[#allocation2 + $0x80] sm:$0xff] }
 0x14a   :  { %346 = vst [vmem:[#allocation2 + $0xb0] sm:$0xf0] %v334_v60  ;;  %v328_v25 = vpop.permute.xlu1 %327  ;;  %1037 = vrot.lane.b32.xlu0 %v1841_v6, %s2749_s24 }
 0x14b   :  { %v335_v52 = vsel %vm329_vm6, %v326_v29, %v328_v25  ;;  %v1122_v41 = vld [vmem:[#allocation2 + $0x88] sm:$0xff]  ;;  %vm2753_vm6 = vmmov %vm2752_vm5 }
 0x14c   :  { %347 = vst [vmem:[#allocation2 + $0xb8] sm:$0xf0] %v335_v52  ;;  %1039 = vrot.lane.b32.xlu1 %v1838_v22, %s2749_s24  ;;  %v544_v32 = vpop.permute.xlu0 %543 }
 0x14d   :  { %v554_v27 = vsel %vm551_vm11, %v2219_v34, %v544_v32  ;;  %v1183_v34 = vld [vmem:[%s2737_s2] sm:$0xff] }
 0x14e   :  { %566 = vst [vmem:[#allocation2 + $0x130] sm:$0xf] %v554_v27  ;;  %v2580_v10 = vpop.permute.xlu1 %545  ;;  %1081 = vrot.lane.b32.xlu0 %v2156_v51, %s1889_s19 }
 0x14f   :  { %v555_v33 = vsel %vm551_vm11, %v544_v32, %v2580_v10 }
 0x150   :  { %567 = vst [vmem:[#allocation2 + $0x138] sm:$0xf] %v555_v33  ;;  %v589_v35 = vpop.permute.xlu0 %588  ;;  %1083 = vrot.lane.b32.xlu1 %v1063_v36, %s1889_s19 }
 0x151   :  { %v599_v38 = vsel %vm2750_vm3, %v2227_v37, %v589_v35  ;;  %v1127_v51 = vld [vmem:[#allocation2 + $0xb0] sm:$0xff]  ;;  %vm2754_vm3 = vcmask 556032  }
 0x152   :  { %611 = vst [vmem:[#allocation2 + $0x130] sm:$0xf0] %v599_v38  ;;  %v2592_v42 = vpop.permute.xlu1 %590  ;;  %1186 = vperm.xlu0 %1818, %v1183_v34   ;;  %v1768_v37 = vpack.c.bf16 %v1127_v51, %v1121_v2 }
 0x153   :  { %v600_v44 = vsel %vm2751_vm4, %v589_v35, %v2592_v42  ;;  %v1128_v46 = vld [vmem:[#allocation2 + $0xb8] sm:$0xff]  ;;  %vm2755_vm4 = vmmov %vm2754_vm3 }
 0x154   :  { %612 = vst [vmem:[#allocation2 + $0x138] sm:$0xf0] %v600_v44  ;;  %v633_v47 = vpop.permute.xlu0 %632  ;;  %v1766_v50 = vpack.c.bf16 %v1128_v46, %v1122_v41 }
 0x155   :  { %v643_v53 = vsel %vm2752_vm5, %v2235_v45, %v633_v47  ;;  %vm2760_vm5 = vcmask 531456  }
 0x156   :  { %655 = vst [vmem:[#allocation2 + $0x160] sm:$0xf] %v643_v53  ;;  %v2598_v54 = vpop.permute.xlu1 %634  ;;  %1767 = vmatprep.subr.bf16.mxu0 %v1766_v50 }
 0x157   :  { %v644_v9 = vsel %vm2753_vm6, %v633_v47, %v2598_v54  ;;  %1769 = vmatpush1.bf16.msra.mxu0 %v1768_v37  ;;  %vm2761_vm6 = vmmov %vm2760_vm5 }
 0x158   :  { %656 = vst [vmem:[#allocation2 + $0x168] sm:$0xf] %v644_v9  ;;  %v678_v55 = vpop.permute.xlu0 %677 }
 0x159   :  { %v688_v49 = vsel %vm2754_vm3, %v2243_v48, %v678_v55  ;;  %vm2762_vm3 = vcmask 523264  }
 0x15a   :  { %700 = vst [vmem:[#allocation2 + $0x160] sm:$0xf0] %v688_v49  ;;  %v2604_v56 = vpop.permute.xlu1 %679 }
 0x15b   :  { %v689_v45 = vsel %vm2755_vm4, %v678_v55, %v2604_v56  ;;  %v1144_v3 = vld [vmem:[#allocation2 + $0x138] sm:$0xff]  ;;  %vm2763_vm4 = vmmov %vm2762_vm3 }
 0x15c   :  { %701 = vst [vmem:[#allocation2 + $0x168] sm:$0xf0] %v689_v45  ;;  %v370_v14 = vpop.permute.xlu0 %369 }
 0x15d   :  { %v378_v58 = vsel %vm373_vm7, %v2472_v4, %v370_v14  ;;  %v1143_v4 = vld [vmem:[#allocation2 + $0x130] sm:$0xff] }
 0x15e   :  { %390 = vst [vmem:[#allocation2 + $0xe0] sm:$0xf] %v378_v58  ;;  %v372_v12 = vpop.permute.xlu1 %371 }
 0x15f   :  { %v379_v1 = vsel %vm373_vm7, %v370_v14, %v372_v12  ;;  %vm2756_vm7 = vcmask 547840  }
 0x160   :  { %391 = vst [vmem:[#allocation2 + $0xe8] sm:$0xf] %v379_v1  ;;  %v415_v59 = vpop.permute.xlu0 %414 }
 0x161   :  { %v423_v48 = vsel %vm418_vm8, %v2484_v8, %v415_v59  ;;  %v1149_v0 = vld [vmem:[#allocation2 + $0x160] sm:$0xff] }
 0x162   :  { %435 = vst [vmem:[#allocation2 + $0xe0] sm:$0xf0] %v423_v48  ;;  %v417_v61 = vpop.permute.xlu1 %416  ;;  %v1752_v7 = vpack.c.bf16 %v1149_v0, %v1143_v4 }
 0x163   :  { %v424_v62 = vsel %vm418_vm8, %v415_v59, %v417_v61  ;;  %v1150_v18 = vld [vmem:[#allocation2 + $0x168] sm:$0xff]  ;;  %vm2757_vm8 = vmmov %vm2756_vm7 }
 0x164   :  { %436 = vst [vmem:[#allocation2 + $0xe8] sm:$0xf0] %v424_v62  ;;  %v459_v5 = vpop.permute.xlu0 %458  ;;  %v1750_v13 = vpack.c.bf16 %v1150_v18, %v1144_v3 }
 0x165   :  { %v467_v15 = vsel %vm462_vm9, %v2496_v24, %v459_v5 }
 0x166   :  { %479 = vst [vmem:[#allocation2 + $0x110] sm:$0xf] %v467_v15  ;;  %v461_v28 = vpop.permute.xlu1 %460  ;;  %1751 = vmatprep.subr.bf16.mxu1 %v1750_v13 }
 0x167   :  { %v468_v8 = vsel %vm462_vm9, %v459_v5, %v461_v28  ;;  %1753 = vmatpush1.bf16.msra.mxu1 %v1752_v7  ;;  %vm2758_vm9 = vcmask 539648  }
 0x168   :  { %480 = vst [vmem:[#allocation2 + $0x118] sm:$0xf] %v468_v8  ;;  %v504_v57 = vpop.permute.xlu0 %503 }
 0x169   :  { %v512_v20 = vsel %vm507_vm10, %v2508_v31, %v504_v57  ;;  %v1133_v34 = vld [vmem:[#allocation2 + $0xe0] sm:$0xff] }
 0x16a   :  { %524 = vst [vmem:[#allocation2 + $0x110] sm:$0xf0] %v512_v20  ;;  %v506_v21 = vpop.permute.xlu1 %505 }
 0x16b   :  { %v513_v29 = vsel %vm507_vm10, %v504_v57, %v506_v21  ;;  %vm2759_vm10 = vmmov %vm2758_vm9  ;;  %v1134_v36 = vld [vmem:[#allocation2 + $0xe8] sm:$0xff] }
 0x16c   :  { %525 = vst [vmem:[#allocation2 + $0x118] sm:$0xf0] %v513_v29  ;;  %v722_v22 = vpop.permute.xlu0 %721 }
 0x16d   :  { %v732_v24 = vsel %vm2756_vm7, %v2269_v11, %v722_v22  ;;  %vm2764_vm7 = vcmask 695296  }
 0x16e   :  { %744 = vst [vmem:[#allocation2 + $0x190] sm:$0xf] %v732_v24  ;;  %v2622_v60 = vpop.permute.xlu1 %723 }
 0x16f   :  { %v733_v25 = vsel %vm2757_vm8, %v722_v22, %v2622_v60  ;;  %vm2765_vm8 = vmmov %vm2764_vm7 }
 0x170   :  { %745 = vst [vmem:[#allocation2 + $0x198] sm:$0xf] %v733_v25  ;;  %v767_v6 = vpop.permute.xlu0 %766 }
 0x171   :  { %v777_v31 = vsel %vm2758_vm9, %v2279_v19, %v767_v6  ;;  %v1139_v32 = vld [vmem:[#allocation2 + $0x110] sm:$0xff]  ;;  %vm2766_vm9 = vcmask 687104  }
 0x172   :  { %789 = vst [vmem:[#allocation2 + $0x190] sm:$0xf0] %v777_v31  ;;  %v2628_v52 = vpop.permute.xlu1 %768  ;;  %v1772_v40 = vpack.c.bf16 %v1139_v32, %v1133_v34 }
 0x173   :  { %v778_v27 = vsel %vm2759_vm10, %v767_v6, %v2628_v52  ;;  %v1140_v11 = vld [vmem:[#allocation2 + $0x118] sm:$0xff]  ;;  %vm2768_vm10 = vcmask 556032  }
 0x174   :  { %790 = vst [vmem:[#allocation2 + $0x198] sm:$0xf0] %v778_v27  ;;  %v811_v33 = vpop.permute.xlu0 %810  ;;  %v1770_v35 = vpack.c.bf16 %v1140_v11, %v1134_v36 }
 0x175   :  { %v821_v38 = vsel %vm2760_vm5, %v2289_v26, %v811_v33  ;;  %vm2769_vm5 = vmmov %vm2768_vm10 }
 0x176   :  { %833 = vst [vmem:[#allocation2 + $0x1c0] sm:$0xf] %v821_v38  ;;  %v2634_v51 = vpop.permute.xlu1 %812  ;;  %1771 = vmatprep.subr.bf16.mxu0 %v1770_v35 }
 0x177   :  { %v822_v19 = vsel %vm2761_vm6, %v811_v33, %v2634_v51  ;;  %1773 = vmatpush1.bf16.msra.mxu0 %v1772_v40  ;;  %vm2770_vm6 = vcmask 547840  }
 0x178   :  { %834 = vst [vmem:[#allocation2 + $0x1c8] sm:$0xf] %v822_v19  ;;  %v856_v44 = vpop.permute.xlu0 %855 }
 0x179   :  { %v866_v41 = vsel %vm2762_vm3, %v2297_v30, %v856_v44  ;;  %vm2771_vm3 = vmmov %vm2770_vm6 }
 0x17a   :  { %878 = vst [vmem:[#allocation2 + $0x1c0] sm:$0xf0] %v866_v41  ;;  %v2640_v46 = vpop.permute.xlu1 %857 }
 0x17b   :  { %v867_v26 = vsel %vm2763_vm4, %v856_v44, %v2640_v46  ;;  %v1156_v45 = vld [vmem:[#allocation2 + $0x198] sm:$0xff]  ;;  %vm2772_vm4 = vcmask 539648  }
 0x17c   :  { %879 = vst [vmem:[#allocation2 + $0x1c8] sm:$0xf0] %v867_v26  ;;  %v548_v47 = vpop.permute.xlu0 %547 }
 0x17d   :  { %v556_v50 = vsel %vm551_vm11, %v2580_v10, %v548_v47  ;;  %v1155_v10 = vld [vmem:[#allocation2 + $0x190] sm:$0xff] }
 0x17e   :  { %568 = vst [vmem:[#allocation2 + $0x140] sm:$0xf] %v556_v50  ;;  %v550_v2 = vpop.permute.xlu1 %549 }
 0x17f   :  { %v557_v53 = vsel %vm551_vm11, %v548_v47, %v550_v2  ;;  %vm2767_vm11 = vmmov %vm2766_vm9 }
 0x180   :  { %569 = vst [vmem:[#allocation2 + $0x148] sm:$0xf] %v557_v53  ;;  %v593_v37 = vpop.permute.xlu0 %592 }
 0x181   :  { %v601_v30 = vsel %vm2764_vm7, %v2592_v42, %v593_v37  ;;  %v1161_v55 = vld [vmem:[#allocation2 + $0x1c0] sm:$0xff]  ;;  %vm2773_vm7 = vmmov %vm2772_vm4 }
 0x182   :  { %613 = vst [vmem:[#allocation2 + $0x140] sm:$0xf0] %v601_v30  ;;  %v595_v9 = vpop.permute.xlu1 %594  ;;  %v1756_v59 = vpack.c.bf16 %v1161_v55, %v1155_v10 }
 0x183   :  { %v602_v49 = vsel %vm2765_vm8, %v593_v37, %v595_v9  ;;  %v1162_v14 = vld [vmem:[#allocation2 + $0x1c8] sm:$0xff]  ;;  %vm2774_vm8 = vcmask 531456  }
 0x184   :  { %614 = vst [vmem:[#allocation2 + $0x148] sm:$0xf0] %v602_v49  ;;  %v637_v58 = vpop.permute.xlu0 %636  ;;  %v1754_v12 = vpack.c.bf16 %v1162_v14, %v1156_v45 }
 0x185   :  { %v645_v1 = vsel %vm2766_vm9, %v2598_v54, %v637_v58  ;;  %vm2775_vm9 = vmmov %vm2774_vm8 }
 0x186   :  { %657 = vst [vmem:[#allocation2 + $0x170] sm:$0xf] %v645_v1  ;;  %v639_v48 = vpop.permute.xlu1 %638  ;;  %1755 = vmatprep.subr.bf16.mxu1 %v1754_v12 }
 0x187   :  { %v646_v42 = vsel %vm2767_vm11, %v637_v58, %v639_v48  ;;  %1757 = vmatpush1.bf16.msra.mxu1 %v1756_v59  ;;  %vm2776_vm11 = vcmask 523264  }
 0x188   :  { %658 = vst [vmem:[#allocation2 + $0x178] sm:$0xf] %v646_v42  ;;  %v682_v61 = vpop.permute.xlu0 %681 }
 0x189   :  { %v690_v0 = vsel %vm2768_vm10, %v2604_v56, %v682_v61  ;;  %v1145_v21 = vld [vmem:[#allocation2 + $0x140] sm:$0xff]  ;;  %vm2777_vm10 = vmmov %vm2776_vm11 }
 0x18a   :  { %702 = vst [vmem:[#allocation2 + $0x170] sm:$0xf0] %v690_v0  ;;  %v684_v62 = vpop.permute.xlu1 %683 }
 0x18b   :  { %v691_v3 = vsel %vm2769_vm5, %v682_v61, %v684_v62  ;;  %v1146_v8 = vld [vmem:[#allocation2 + $0x148] sm:$0xff] }
 0x18c   :  { %703 = vst [vmem:[#allocation2 + $0x178] sm:$0xf0] %v691_v3  ;;  %v900_v18 = vpop.permute.xlu0 %899 }
 0x18d   :  { %v910_v54 = vsel %vm907_vm12, %v2353_v17, %v900_v18 }
 0x18e   :  { %922 = vst [vmem:[#allocation2 + $0x1f0] sm:$0xf] %v910_v54  ;;  %v2658_v5 = vpop.permute.xlu1 %901 }
 0x18f   :  { %v911_v13 = vsel %vm907_vm12, %v900_v18, %v2658_v5 }
 0x190   :  { %923 = vst [vmem:[#allocation2 + $0x1f8] sm:$0xf] %v911_v13  ;;  %v945_v4 = vpop.permute.xlu0 %944 }
 0x191   :  { %v955_v56 = vsel %vm952_vm13, %v2363_v23, %v945_v4  ;;  %v1151_v7 = vld [vmem:[#allocation2 + $0x170] sm:$0xff] }
 0x192   :  { %967 = vst [vmem:[#allocation2 + $0x1f0] sm:$0xf0] %v955_v56  ;;  %v2664_v15 = vpop.permute.xlu1 %946  ;;  %v1776_v22 = vpack.c.bf16 %v1151_v7, %v1145_v21 }
 0x193   :  { %v956_v28 = vsel %vm952_vm13, %v945_v4, %v2664_v15  ;;  %v1152_v17 = vld [vmem:[#allocation2 + $0x178] sm:$0xff] }
 0x194   :  { %968 = vst [vmem:[#allocation2 + $0x1f8] sm:$0xf0] %v956_v28  ;;  %v989_v57 = vpop.permute.xlu0 %988  ;;  %v1774_v20 = vpack.c.bf16 %v1152_v17, %v1146_v8 }
 0x195   :  { %v999_v29 = vsel %vm996_vm14, %v2371_v39, %v989_v57 }
 0x196   :  { %1011 = vst [vmem:[#allocation2 + $0x220] sm:$0xf] %v999_v29  ;;  %v2670_v24 = vpop.permute.xlu1 %990  ;;  %1775 = vmatprep.subr.bf16.mxu0 %v1774_v20 }
 0x197   :  { %v1000_v23 = vsel %vm996_vm14, %v989_v57, %v2670_v24  ;;  %1777 = vmatpush1.bf16.msra.mxu0 %v1776_v22 }
 0x198   :  { %1012 = vst [vmem:[#allocation2 + $0x228] sm:$0xf] %v1000_v23  ;;  %v1034_v25 = vpop.permute.xlu0 %1033 }
 0x199   :  { %v1044_v6 = vsel %vm1041_vm15, %v2379_v43, %v1034_v25 }
 0x19a   :  { %1056 = vst [vmem:[#allocation2 + $0x220] sm:$0xf0] %v1044_v6  ;;  %v2676_v31 = vpop.permute.xlu1 %1035 }
 0x19b   :  { %v1045_v39 = vsel %vm1041_vm15, %v1034_v25, %v2676_v31  ;;  %v1168_v40 = vld [vmem:[#allocation2 + $0x1f8] sm:$0xff] }
 0x19c   :  { %1057 = vst [vmem:[#allocation2 + $0x228] sm:$0xf0] %v1045_v39  ;;  %v726_v32 = vpop.permute.xlu0 %725  ;;  %v1892_v39 = vmov 1983009808  }
 0x19d   :  { %v734_v27 = vsel %vm2770_vm6, %v2622_v60, %v726_v32  ;;  %v1167_v60 = vld [vmem:[#allocation2 + $0x1f0] sm:$0xff] }
 0x19e   :  { %746 = vst [vmem:[#allocation2 + $0x1a0] sm:$0xf] %v734_v27  ;;  %v728_v36 = vpop.permute.xlu1 %727  ;;  %v1451_v27 = vlaneseq }
 0x19f   :  { %v735_v11 = vsel %vm2771_vm3, %v726_v32, %v728_v36  ;;  %v1449_v32 = vunpack.c.l.s4 %v1892_v39 }
 0x1a0   :  { %747 = vst [vmem:[#allocation2 + $0x1a8] sm:$0xf] %v735_v11  ;;  %v771_v33 = vpop.permute.xlu0 %770  ;;  %v1452_v11 = vshrl.u32 %v1451_v27, 7 }
 0x1a1   :  { %v779_v43 = vsel %vm2772_vm4, %v2628_v52, %v771_v33  ;;  %v1173_v34 = vld [vmem:[#allocation2 + $0x220] sm:$0xff]  ;;  %v1450_v36 = vunpack.c.0.s8 %v1449_v32 }
 0x1a2   :  { %791 = vst [vmem:[#allocation2 + $0x1a0] sm:$0xf0] %v779_v43  ;;  %v773_v35 = vpop.permute.xlu1 %772  ;;  %v1760_v47 = vpack.c.bf16 %v1173_v34, %v1167_v60 }
 0x1a3   :  { %v780_v38 = vsel %vm2773_vm7, %v771_v33, %v773_v35  ;;  %v1174_v19 = vld [vmem:[#allocation2 + $0x228] sm:$0xff]  ;;  %v1443_v33 = vld [vmem:[%s2738_s3] sm:$0xff]  ;;  %v1453_v43 = vsub.s32 %v1450_v36, %v1452_v11 }
 0x1a4   :  { %792 = vst [vmem:[#allocation2 + $0x1a8] sm:$0xf0] %v780_v38  ;;  %v815_v44 = vpop.permute.xlu0 %814  ;;  %v1758_v41 = vpack.c.bf16 %v1174_v19, %v1168_v40 }
 0x1a5   :  { %v823_v26 = vsel %vm2774_vm8, %v2634_v51, %v815_v44  ;;  %v1454_v35 = vrot.slane %v1443_v33, %v1453_v43 }
 0x1a6   :  { %835 = vst [vmem:[#allocation2 + $0x1d0] sm:$0xf] %v823_v26  ;;  %v817_v50 = vpop.permute.xlu1 %816  ;;  %1759 = vmatprep.subr.bf16.mxu1 %v1758_v41 }
 0x1a7   :  { %v824_v52 = vsel %vm2775_vm9, %v815_v44, %v817_v50  ;;  %1761 = vmatpush1.bf16.msra.mxu1 %v1760_v47  ;;  %v1462_v34 = vcombine.high %v1454_v35, %v1454_v35  ;;  %v1447_v50 = vcombine.high %v1443_v33, %v1443_v33 }
 0x1a8   :  { %836 = vst [vmem:[#allocation2 + $0x1d8] sm:$0xf] %v824_v52  ;;  %v860_v2 = vpop.permute.xlu0 %859 }
 0x1a9   :  { %v868_v53 = vsel %vm2776_vm11, %v2640_v46, %v860_v2  ;;  %v1461_v52 = vrot.slane %v1447_v50, %v1453_v43 }
 0x1aa   :  { %880 = vst [vmem:[#allocation2 + $0x1d0] sm:$0xf0] %v868_v53  ;;  %v862_v37 = vpop.permute.xlu1 %861 }
 0x1ab   :  { %v869_v30 = vsel %vm2777_vm10, %v860_v2, %v862_v37  ;;  %v1158_v10 = vld [vmem:[#allocation2 + $0x1a8] sm:$0xff]  ;;  %v1463_v2 = vcombine.high %v1461_v52, %v1461_v52 }
 0x1ac   :  { %881 = vst [vmem:[#allocation2 + $0x1d8] sm:$0xf0] %v869_v30  ;;  %v1078_v9 = vpop.permute.xlu0 %1077 }
 0x1ad   :  { %v1088_v51 = vsel %vm1085_vm0, %v2518_v16, %v1078_v9  ;;  %v1157_v16 = vld [vmem:[#allocation2 + $0x1a0] sm:$0xff] }
 0x1ae   :  { %1100 = vst [vmem:[#allocation2 + $0x250] sm:$0xf] %v1088_v51  ;;  %v1080_v55 = vpop.permute.xlu1 %1079 }
 0x1af   :  { %v1089_v49 = vsel %vm1085_vm0, %v1078_v9, %v1080_v55 }
 0x1b0   :  { %1101 = vst [vmem:[#allocation2 + $0x258] sm:$0xf] %v1089_v49  ;;  %v904_v45 = vpop.permute.xlu0 %903 }
 0x1b1   :  { %v912_v14 = vsel %vm907_vm12, %v2658_v5, %v904_v45  ;;  %v1163_v58 = vld [vmem:[#allocation2 + $0x1d0] sm:$0xff] }
 0x1b2   :  { %924 = vst [vmem:[#allocation2 + $0x200] sm:$0xf] %v912_v14  ;;  %v906_v46 = vpop.permute.xlu1 %905  ;;  %v1780_v61 = vpack.c.bf16 %v1163_v58, %v1157_v16 }
 0x1b3   :  { %v913_v12 = vsel %vm907_vm12, %v904_v45, %v906_v46  ;;  %v1164_v1 = vld [vmem:[#allocation2 + $0x1d8] sm:$0xff]  ;;  %v1713_v45 = vld.sshfl [vmem:[%s2738_s3 + $0x8] sm:$0x33 pattern:$0x76325410]  ;;  %s1893_s3 = smov [#allocation3]  }
 0x1b4   :  { %925 = vst [vmem:[#allocation2 + $0x208] sm:$0xf] %v913_v12  ;;  %v949_v59 = vpop.permute.xlu0 %948  ;;  %v1778_v48 = vpack.c.bf16 %v1164_v1, %v1158_v10  ;;  %v1471_v46 = vcombine.high %v1713_v45, %v1713_v45  ;;  %s1696_s24 = sshll.u32 %s1893_s3, 4  ;;  %s1697_s24 = int_to_ptr.vmem [resolvable:$true] %s1696_s24 }
 0x1b5   :  { %v957_v42 = vsel %vm952_vm13, %v2664_v15, %v949_v59  ;;  %v1179_v54 = vld [vmem:[#allocation2 + $0x250] sm:$0xf]  ;;  %s1842_s25 = scalar_lea.vmem %s1697_s24, 32  ;;  %p1847_p1 = scmp.lt.s32.totalorder %s1697_s24, %s1697_s24 }
 0x1b6   :  { %969 = vst [vmem:[#allocation2 + $0x200] sm:$0xf0] %v957_v42  ;;  %v951_v0 = vpop.permute.xlu1 %950  ;;  %1779 = vmatprep.subr.bf16.mxu0 %v1778_v48  ;;  %p1843_p0 = scmp.ne.s32.totalorder %s1697_s24, %s1842_s25  ;;  %p1848_p2 = scmp.lt.s32.totalorder %s1842_s25, %s1842_s25 }
 0x1b7   :  { %v958_v62 = vsel %vm952_vm13, %v949_v59, %v951_v0  ;;  %1781 = vmatpush1.bf16.msra.mxu0 %v1780_v61  ;;  %v1180_v3 = vld [vmem:[#allocation2 + $0x258] sm:$0xf] }
 0x1b8   :  { %970 = vst [vmem:[#allocation2 + $0x208] sm:$0xf0] %v958_v62  ;;  %v993_v18 = vpop.permute.xlu0 %992  ;;  %1707 = vmatprep.subr.msk.mxu1 %vm1193_vm1, %v1180_v3  ;;  %p1849_p3 = por %p1848_p2, %p1847_p1 }
 0x1b9   :  { %v1001_v5 = vsel %vm996_vm14, %v2670_v24, %v993_v18  ;;  %1708 = vmatpush1.msk.msra.mxu1 %vm1193_vm1, %v1179_v54 }
 0x1ba   :  { %1013 = vst [vmem:[#allocation2 + $0x230] sm:$0xf] %v1001_v5  ;;  %v995_v13 = vpop.permute.xlu1 %994  ;;  %1709 = vmatmul.mubr.msk.f32.vlgmr.msra.gmra.mrb[0].mxu1 %vm1189_vm2, %v2547_v63  ;;  %p1850_p4 = pnand %p1849_p3, %p1843_p0 }
 0x1bb   :  { %v1002_v4 = vsel %vm996_vm14, %v993_v18, %v995_v13  ;;  %1542 = vmatprep.mubr.f32.mxu1 %v1462_v34 }
 0x1bc   :  { %1014 = vst [vmem:[#allocation2 + $0x238] sm:$0xf] %v1002_v4  ;;  %v1038_v56 = vpop.permute.xlu0 %1037 }
 0x1bd   :  { %v1046_v15 = vsel %vm1041_vm15, %v2676_v31, %v1038_v56  ;;  %v1169_v23 = vld [vmem:[#allocation2 + $0x200] sm:$0xff] }
 0x1be   :  { %1058 = vst [vmem:[#allocation2 + $0x230] sm:$0xf0] %v1046_v15  ;;  %v1040_v7 = vpop.permute.xlu1 %1039 }
 0x1bf   :  { %v1047_v28 = vsel %vm1041_vm15, %v1038_v56, %v1040_v7  ;;  %v1170_v29 = vld [vmem:[#allocation2 + $0x208] sm:$0xff] }
 0x1c0   :  { %1059 = vst [vmem:[#allocation2 + $0x238] sm:$0xf0] %v1047_v28  ;;  %v1082_v8 = vpop.permute.xlu0 %1081 }
 0x1c1   :  { %v1090_v17 = vsel %vm1085_vm0, %v1080_v55, %v1082_v8 }
 0x1c2   :  { %1102 = vst [vmem:[#allocation2 + $0x260] sm:$0xf] %v1090_v17  ;;  %v1084_v57 = vpop.permute.xlu1 %1083 }
 0x1c3   :  { %v1091_v20 = vsel %vm1085_vm0, %v1082_v8, %v1084_v57 }
 0x1c4   :  { %1103 = vst [vmem:[#allocation2 + $0x268] sm:$0xf] %v1091_v20 }
 0x1c5   :  { %v1175_v21 = vld [vmem:[#allocation2 + $0x230] sm:$0xff] }
 0x1c6   :  { %v1784_v25 = vpack.c.bf16 %v1175_v21, %v1169_v23 }
 0x1c7   :  { %v1176_v22 = vld [vmem:[#allocation2 + $0x238] sm:$0xff] }
 0x1c8   :  { %v1782_v24 = vpack.c.bf16 %v1176_v22, %v1170_v29 }
 0x1c9   :  { %v1181_v31 = vld [vmem:[#allocation2 + $0x260] sm:$0xf] }
 0x1ca   :  { %1783 = vmatprep.subr.bf16.mxu0 %v1782_v24 }
 0x1cb   :  { %1785 = vmatpush1.bf16.msra.mxu0 %v1784_v25  ;;  %v1182_v6 = vld [vmem:[#allocation2 + $0x268] sm:$0xf] }
 0x1cc   :  { %1710 = vmatprep.subr.msk.mxu0 %vm1193_vm1, %v1182_v6 }
 0x1cf   :  { %1711 = vmatpush1.msk.msra.mxu0 %vm1193_vm1, %v1181_v31 }
 0x1d0   :  { %1712 = vmatmul.mubr.msk.f32.vlgmr.msra.gmra.mrb[2].mxu0 %vm1189_vm2, %v2547_v63  ;;  %vm1688_vm2 = vcmask 58368  }
 0x1d1   :  { %v1187_v38 = vpop.permute.xlu0 %1186 }
 0x218   :  { %v1278_v40 = vpop.f32.mrb[0].mxu0 }
 0x219   :  { %v1280_v19 = vpop.f32.mrb[1].mxu0  ;;  %v1279_v44 = vadd.f32 %v1278_v40, %v1187_v38 }
 0x21a   :  { %v1281_v41 = vadd.f32 %v1280_v19, %v1187_v38 }
 0x21b   :  { %vm1425_vm12 = vcmp.gt.f32.partialorder %v1279_v44, 0.0  ;;  %v1431_v63 = vmul.f32 0.62, %v1279_v44 }
 0x21c   :  { %v1432_v60 = vmul.f32 0.62, %v1281_v41  ;;  %vm1426_vm13 = vcmp.gt.f32.partialorder %v1281_v41, 0.0 }
 0x21d   :  { %v1437_v26 = vsel %vm1425_vm12, %v1279_v44, %v1431_v63 }
 0x21e   :  { %v1438_v47 = vsel %vm1426_vm13, %v1281_v41, %v1432_v60 }
 0x21f   :  { %1478 = vmatprep.subr.mxu1 %v1438_v47 }
 0x220   :  { %1479 = vmatpush1.xpose.msra.mxu1 %v1437_v26 }
 0x223   :  { %1543 = vmatmul.mubr.f32.vlgmr.msra.gmra.mrb[2].mxu1 %v1454_v35 }
 0x224   :  { %1612 = vmatprep.mubr.f32.mxu1 %v1463_v2 }
 0x28d   :  { %v1349_v53 = vpop.f32.mrb[0].mxu1 }
 0x28e   :  { %v1350_v37 = vadd.f32 %v1349_v53, %v1187_v38  ;;  %v1351_v30 = vpop.f32.mrb[1].mxu1 }
 0x28f   :  { %v1352_v9 = vadd.f32 %v1351_v30, %v1187_v38 }
 0x290   :  { %vm1427_vm14 = vcmp.gt.f32.partialorder %v1350_v37, 0.0  ;;  %v1433_v51 = vmul.f32 0.62, %v1350_v37 }
 0x291   :  { %v1434_v55 = vmul.f32 0.62, %v1352_v9  ;;  %vm1428_vm15 = vcmp.gt.f32.partialorder %v1352_v9, 0.0 }
 0x292   :  { %v1439_v49 = vsel %vm1427_vm14, %v1350_v37, %v1433_v51 }
 0x293   :  { %v1440_v14 = vsel %vm1428_vm15, %v1352_v9, %v1434_v55 }
 0x294   :  { %1548 = vmatprep.subr.mxu1 %v1440_v14 }
 0x295   :  { %1549 = vmatpush1.xpose.msra.mxu1 %v1439_v49 }
 0x298   :  { %1613 = vmatmul.mubr.f32.vlgmr.msra.gmra.mrb[2].mxu1 %v1461_v52 }
 0x299   :  { %1682 = vmatprep.mubr.f32.mxu1 %v1471_v46 }
 0x2a3   :  { %v1420_v58 = vpop.f32.mrb[2].mxu0 }
 0x2a4   :  { %v1421_v12 = vadd.f32 %v1420_v58, %v1187_v38  ;;  %v1422_v10 = vpop.f32.mrb[3].mxu0 }
 0x2a5   :  { %v1423_v1 = vadd.f32 %v1422_v10, %v1187_v38 }
 0x2a6   :  { %v1435_v59 = vmul.f32 0.62, %v1421_v12  ;;  %vm1429_vm0 = vcmp.gt.f32.partialorder %v1421_v12, 0.0 }
 0x2a7   :  { %v1436_v48 = vmul.f32 0.62, %v1423_v1  ;;  %vm1430_vm1 = vcmp.gt.f32.partialorder %v1423_v1, 0.0 }
 0x2a8   :  { %v1441_v42 = vsel %vm1429_vm0, %v1421_v12, %v1435_v59 }
 0x2a9   :  { %v1442_v16 = vsel %vm1430_vm1, %v1423_v1, %v1436_v48 }
 0x2aa   :  { %1618 = vmatprep.subr.mxu1 %v1442_v16 }
 0x2ab   :  { %1619 = vmatpush1.xpose.msra.mxu1 %v1441_v42 }
 0x2ae   :  { %1683 = vmatmul.mubr.f32.vlgmr.msra.gmra.mrb[2].mxu1 %v1713_v45 }
 0x381   :  { %v1684_v61 = vpop.f32.mrb[2].mxu1 }
 0x382   :  { %1689 = vst.msk [vmem:[#allocation3] sm:$0x3] %vm1688_vm2, %v1684_v61  ;;  %v1686_v0 = vpop.f32.mrb[3].mxu1 }
 0x383   :  { %1853 = shalt.err (!%p1850_p4)
}
 0x384   :  { %s1854_s26 = scalar_lea.hbm %s2739_s4, 32 }
 0x385   :  { %p1855_p5 = scmp.ne.s32.totalorder %s2739_s4, %s1854_s26  ;;  %p1858_p6 = scmp.lt.u32.totalorder %s1854_s26, %s2739_s4 }
 0x387   :  { %p1860_p7 = pnand %p1858_p6, %p1855_p5 }
 0x389   :  { %1863 = shalt.err (!%p1860_p7)
}
 0x38a   :  { %1699 = dma.vmem_to_hbm [thread:$0]  %s1697_s24, 32, %s2739_s4, [#allocation4]  }
 0x38b   :  { %1864 = dma.done.wait [#allocation4], 32  }
 0x38c   :  { %1865 = vsyncadd [#allocation4], 4294967264 }
 0x38d   :  { %1703 = vsyncpa [#allocation4], 1 }

</bundles_post_ra>
